<compile_context>
chip_gen: v6e
topology: v6e:2x2x1
jax: 0.10.0
libtpu: 0.0.40
codegen_flags: <defaults>
</compile_context>

<pallas_src>
import functools

import numpy as np
import jax
import jax.numpy as jnp
from jax.experimental import pallas as pl
from jax.experimental.pallas import tpu as pltpu


# Matmul operand dtype. bf16 would roughly quadruple MXU throughput on
# v6e/v7x and halve HBM/VMEM traffic, but does not hold the 1e-4 tolerance of
# the f32 reference, so f32 is the default. Accumulation is always f32.
_MM_DTYPE = jnp.float32
# Working intermediates stay f32, so tile-aligned folds use the f32 sublane
# pack of 8 (it would be 16 only if the intermediates themselves were bf16).
_SUBLANE = 8


# ---------------------------------------------------------------------------
# Host-side constants (precomputed once per (H, W, levels)).
# ---------------------------------------------------------------------------
def _gaussian_1d(kernel_size=5, sigma=1.0):
    xs = np.arange(kernel_size, dtype=np.float64) - (kernel_size - 1) / 2.0
    k = np.exp(-(xs ** 2) / (2.0 * sigma ** 2))
    return (k / k.sum()).astype(np.float32)


def _blur_band_matrix(n, k1d):
    """Banded matrix B with B[r, c] = k1d[c - r + half] (zero outside band).

    (B @ x) blurs along rows, (x @ B) blurs along columns (k1d symmetric); the
    truncated band reproduces conv2d's zero padding exactly.
    """
    ks = len(k1d)
    half = (ks - 1) // 2
    B = np.zeros((n, n), np.float32)
    for off in range(-half, half + 1):
        v = k1d[off + half]
        r = np.arange(max(0, -off), n - max(0, off))
        B[r, r + off] = v
    return B


def _pool_matrix(n):
    """(n/2, n) matrix averaging adjacent pairs (avg_pool kernel=2, stride=2)."""
    P = np.zeros((n // 2, n), np.float32)
    i = np.arange(n // 2)
    P[i, 2 * i] = 0.5
    P[i, 2 * i + 1] = 0.5
    return P


@functools.lru_cache(maxsize=None)
def _pyramid_matrices(H, W, num_out):
    """[(A_l, C_l)] per level, A_l: (h/2, h), C_l: (w, w/2)."""
    k1d = _gaussian_1d()
    mats = []
    h, w = H, W
    for _ in range(num_out):
        A = _pool_matrix(h) @ _blur_band_matrix(h, k1d)     # (h/2, h)
        C = _blur_band_matrix(w, k1d) @ _pool_matrix(w).T   # (w, w/2)
        mats.append((A.astype(np.float32), C.astype(np.float32)))
        h //= 2
        w //= 2
    return tuple(mats)


# ---------------------------------------------------------------------------
# TPU topology / VMEM budgeting / plane-batch sizing.
# ---------------------------------------------------------------------------
def _tpu_topology():
    """(per-TensorCore VMEM bytes, TensorCore count) -- best-effort query."""
    vmem = 64 * 1024 * 1024            # conservative default (v7x per-TC figure)
    tcs = 1
    try:
        info = pltpu.get_tpu_info()
        v = int(getattr(info, "vmem_capacity_bytes", 0) or 0)
        if v > 0:
            vmem = v
        for name in ("num_tensorcores", "tensorcore_count", "num_cores",
                     "core_count"):
            c = getattr(info, name, None)
            if c:
                tcs = max(tcs, int(c))
                break
    except Exception:
        pass
    try:
        dev = jax.devices()[0]
        for name in ("num_cores", "core_count"):
            c = getattr(dev, name, None)
            if c:
                tcs = max(tcs, int(c))
                break
    except Exception:
        pass
    if tcs >= 2:
        # Multi-TC chip (v7x): budget against the 64 MiB per-core figure even
        # if the query reported a chip-level capacity.
        vmem = min(vmem, 64 * 1024 * 1024)
    return vmem, tcs


def _vmem_limit_bytes(vmem_capacity):
    # Raise above the 32 MiB scoped default; keep ~25% headroom below the
    # physical per-core capacity for Mosaic scratch / relayout buffers.
    return max(32 * 1024 * 1024, min(vmem_capacity * 3 // 4, 112 * 1024 * 1024))


def _choose_plane_batch(num_planes, H, W, num_out, budget_bytes, min_blocks):
    """Largest plane batch P that fits the VMEM budget, divides the plane
    count, and leaves at least `min_blocks` grid blocks (multi-TC chips)."""
    itemsize = 4
    per_plane = 2 * H * W                        # double-buffered input block
    fixed = 0                                    # shared A/C matrices
    h, w = H, W
    for _ in range(num_out):
        h2, w2 = h // 2, w // 2
        fixed += 2 * (h * h2 + w * w2)           # conservatively assume x2 bufs
        per_plane += 2 * h * w2                  # col-pass result + transpose
        per_plane += 4 * h2 * w2                 # row result, transpose, value
        per_plane += 2 * h2 * w2                 # double-buffered output block
        h, w = h2, w2
    budget = max(budget_bytes - fixed * itemsize, per_plane * itemsize)
    p = int(max(1, min(num_planes, budget // (per_plane * itemsize))))
    while p > 1 and pl.cdiv(num_planes, p) < min_blocks:
        p = max(1, p // 2)
    while num_planes % p:
        p -= 1
    return p


# ---------------------------------------------------------------------------
# Fused multi-level pyramid kernel.
# ---------------------------------------------------------------------------
def _level_modes(H, W, num_out, folded_rows):
    """Per-level compute mode (static, shape-driven)."""
    modes = []
    h, w = H, W
    for _ in range(num_out):
        h2, w2 = h // 2, w // 2
        if folded_rows and h % _SUBLANE == 0 and w2 % _SUBLANE == 0:
            modes.append("fold2")      # both passes folded into 2-D MXU matmuls
        elif h % _SUBLANE == 0:
            modes.append("colfold")    # previously validated path
        else:
            modes.append("bcast")      # tiny deep levels only
        h, w = h2, w2
    return tuple(modes)


def _make_pyramid_kernel(num_out, modes):
    """x block (P, H, W) -> outputs (P, H/2^l, W/2^l) for l = 1..num_out."""

    def kernel(*refs):
        x_ref = refs[0]
        mat_refs = refs[1:1 + 2 * num_out]
        out_refs = refs[1 + 2 * num_out:]

        cur = x_ref[...].astype(jnp.float32)                  # (P, h, w)
        for l in range(num_out):
            c = mat_refs[2 * l + 1][...]                       # (w, w2)
            p, h, w = cur.shape
            w2 = c.shape[1]
            cur_mm = cur.astype(_MM_DTYPE)

            if modes[l] == "fold2":
                at = mat_refs[2 * l][...]                      # A^T: (h, h2)
                h2 = at.shape[1]
                # Column pass: one (P*h, w) @ (w, w2) MXU matmul
                # (reshape is free: h % 8 == 0).
                y = jnp.dot(cur_mm.reshape(p * h, w), c,
                            preferred_element_type=jnp.float32).reshape(p, h, w2)
                # Per-plane transpose on the XLU so the row pass also folds the
                # plane batch into ONE matmul (no broadcast copies of A).
                yt = jnp.transpose(y, (0, 2, 1))               # (p, w2, h)
                z = jnp.dot(yt.reshape(p * w2, h).astype(_MM_DTYPE), at,
                            preferred_element_type=jnp.float32).reshape(p, w2, h2)
                cur = jnp.transpose(z, (0, 2, 1))              # (p, h2, w2)
            else:
                a = mat_refs[2 * l][...]                       # A: (h2, h)
                h2 = a.shape[0]
                if modes[l] == "colfold":
                    y = jnp.dot(cur_mm.reshape(p * h, w), c,
                                preferred_element_type=jnp.float32).reshape(p, h, w2)
                else:
                    y = jnp.einsum('phw,pwj->phj', cur_mm,
                                   jnp.broadcast_to(c, (p, w, w2)),
                                   preferred_element_type=jnp.float32)
                cur = jnp.einsum('pik,pkj->pij',
                                 jnp.broadcast_to(a, (p, h2, h)),
                                 y.astype(_MM_DTYPE),
                                 preferred_element_type=jnp.float32)

            out_refs[l][...] = cur.astype(out_refs[l].dtype)

    return kernel


def _cost_estimate(nc, H, W, num_out):
    flops = 0
    bytes_accessed = nc * H * W * 4
    h, w = H, W
    for _ in range(num_out):
        h2, w2 = h // 2, w // 2
        flops += 2 * nc * (h * w * w2 + h2 * h * w2)
        bytes_accessed += nc * h2 * w2 * 4 + (h * h2 + w * w2) * 4
        h, w = h2, w2
    return pl.CostEstimate(flops=flops, transcendentals=0,
                           bytes_accessed=bytes_accessed)


def _build_pyramid_fn(N, C, H, W, num_out, *, folded_rows, single_buffer_consts,
                      with_cost):
    nc = N * C
    vmem_capacity, tcs = _tpu_topology()
    vmem_limit = _vmem_limit_bytes(vmem_capacity)
    min_blocks = 2 * tcs if tcs > 1 else 1       # feed both TCs only on v7x
    P = _choose_plane_batch(nc, H, W, num_out, vmem_limit * 2 // 3, min_blocks)

    modes = _level_modes(H, W, num_out, folded_rows)
    np_mats = _pyramid_matrices(H, W, num_out)
    kernel = _make_pyramid_kernel(num_out, modes)

    const_kwargs = {}
    if single_buffer_consts:
        # Constant index_map => no double buffering needed for A/C.
        const_kwargs = {"pipeline_mode": pl.Buffered(1)}
    extra_call_kwargs = {}
    if with_cost:
        extra_call_kwargs["cost_estimate"] = _cost_estimate(nc, H, W, num_out)

    def fn(x):
        xp = x.reshape(nc, H, W)
        in_specs = [pl.BlockSpec((P, H, W), lambda i: (i, 0, 0))]
        mat_args = []
        for mode, (A, Cm) in zip(modes, np_mats):
            Am = np.ascontiguousarray(A.T) if mode == "fold2" else A
            mat_args.append(jnp.asarray(Am, dtype=_MM_DTYPE))
            mat_args.append(jnp.asarray(Cm, dtype=_MM_DTYPE))
            in_specs.append(pl.BlockSpec(Am.shape, lambda i: (0, 0), **const_kwargs))
            in_specs.append(pl.BlockSpec(Cm.shape, lambda i: (0, 0), **const_kwargs))

        out_shapes, out_specs = [], []
        h, w = H, W
        for _ in range(num_out):
            h //= 2
            w //= 2
            out_shapes.append(jax.ShapeDtypeStruct((nc, h, w), x.dtype))
            out_specs.append(pl.BlockSpec((P, h, w), lambda i: (i, 0, 0)))

        outs = pl.pallas_call(
            kernel,
            out_shape=tuple(out_shapes),
            grid_spec=pltpu.PrefetchScalarGridSpec(
                num_scalar_prefetch=0,
                grid=(nc // P,),
                in_specs=in_specs,
                out_specs=tuple(out_specs),
            ),
            compiler_params=pltpu.CompilerParams(
                dimension_semantics=("parallel",),
                vmem_limit_bytes=vmem_limit,
            ),
            **extra_call_kwargs,
        )(xp, *mat_args)

        res = []
        h, w = H, W
        for o in outs:
            h //= 2
            w //= 2
            res.append(o.reshape(N, C, h, w))
        return tuple(res)

    return jax.jit(fn)


# Structural variants, tried in order.  The last one is exactly the structure
# that already compiled and ran clean, so the kernel degrades gracefully if a
# Mosaic lowering rejects a preferred variant on some TPU generation.
_CANDIDATES = (
    dict(folded_rows=True, single_buffer_consts=True, with_cost=True),
    dict(folded_rows=True, single_buffer_consts=False, with_cost=True),
    dict(folded_rows=False, single_buffer_consts=False, with_cost=False),
)

_FN_CACHE = {}


def _pyramid_levels(x, num_out):
    key = (tuple(x.shape), str(x.dtype), num_out)
    fn = _FN_CACHE.get(key)
    if fn is not None:
        return fn(x)
    N, C, H, W = x.shape
    last_err = None
    for cand in _CANDIDATES:
        try:
            fn = _build_pyramid_fn(N, C, H, W, num_out, **cand)
            out = jax.block_until_ready(fn(x))
            _FN_CACHE[key] = fn
            return out
        except Exception as err:   # lowering/compile rejection -> next variant
            last_err = err
    raise last_err


def enhanced_pyramid_layer(x, levels=3):
    """Matches EnhancedPyramidLayer.forward: [x, level1, ..., level_{levels-1}]."""
    if levels <= 1:
        return [x]
    num_out = levels - 1
    N, C, H, W = x.shape
    assert H % (1 << num_out) == 0 and W % (1 << num_out) == 0, (
        "spatial dims must be divisible by 2**(levels-1)")
    return [x] + list(_pyramid_levels(x, num_out))


# --- plain-JAX reference for the sanity check (not part of the kernel) ------
def _reference_step(x):
    N, C, H, W = x.shape
    k1d = jnp.asarray(_gaussian_1d())
    k2d = jnp.outer(k1d, k1d)
    kernel = jnp.broadcast_to(k2d, (C, 1, 5, 5))
    blurred = jax.lax.conv_general_dilated(
        x, kernel, window_strides=(1, 1), padding=((2, 2), (2, 2)),
        feature_group_count=C, dimension_numbers=("NCHW", "OIHW", "NCHW"))
    pooled = jax.lax.reduce_window(
        blurred, 0.0, jax.lax.add, (1, 1, 2, 2), (1, 1, 2, 2), "VALID") / 4.0
    return pooled


if __name__ == "__main__":
    key = jax.random.PRNGKey(0)
    x = jax.random.normal(key, (2, 4, 16, 16), dtype=jnp.float32)

    pyramid = enhanced_pyramid_layer(x, levels=3)
    pyramid = jax.block_until_ready(pyramid)

    assert pyramid[0].shape == (2, 4, 16, 16)
    assert pyramid[1].shape == (2, 4, 8, 8)
    assert pyramid[2].shape == (2, 4, 4, 4)

    ref = x
    for lvl in range(1, 3):
        ref = _reference_step(ref)
        assert jnp.allclose(pyramid[lvl], ref, atol=1e-4), f"mismatch at level {lvl}"

    print("KERNEL_OK")
</pallas_src>

<mosaic_0001>
module attributes {stable_mosaic.version = 11 : i64} {
  func.func @kernel(%arg0: i32, %arg1: memref<8x16x16xf32, #tpu.memory_space<vmem>>, %arg2: memref<16x8xf32, #tpu.memory_space<vmem>>, %arg3: memref<16x8xf32, #tpu.memory_space<vmem>>, %arg4: memref<4x8xf32, #tpu.memory_space<vmem>>, %arg5: memref<8x4xf32, #tpu.memory_space<vmem>>, %arg6: memref<8x8x8xf32, #tpu.memory_space<vmem>>, %arg7: memref<8x4x4xf32, #tpu.memory_space<vmem>>) attributes {dimension_semantics = [#tpu.dimension_semantics<parallel>], iteration_bounds = array<i64: 1>, scalar_prefetch = 0 : i64, scratch_operands = 0 : i64, tpu.core_type = #tpu.core_type<tc>, window_params = [{transform_indices = @transform_0, window_bounds = array<i64: 8, 16, 16>}, {pipeline_mode = #tpu.pipeline_mode<synchronous>, transform_indices = @transform_1, window_bounds = array<i64: 16, 8>}, {pipeline_mode = #tpu.pipeline_mode<synchronous>, transform_indices = @transform_2, window_bounds = array<i64: 16, 8>}, {pipeline_mode = #tpu.pipeline_mode<synchronous>, transform_indices = @transform_3, window_bounds = array<i64: 4, 8>}, {pipeline_mode = #tpu.pipeline_mode<synchronous>, transform_indices = @transform_4, window_bounds = array<i64: 8, 4>}, {transform_indices = @transform_5, window_bounds = array<i64: 8, 8, 8>}, {transform_indices = @transform_6, window_bounds = array<i64: 8, 4, 4>}]} {
    %c0 = arith.constant 0 : index
    %c0_0 = arith.constant 0 : index
    %c0_1 = arith.constant 0 : index
    %0 = vector.load %arg1[%c0, %c0_0, %c0_1] : memref<8x16x16xf32, #tpu.memory_space<vmem>>, vector<8x16x16xf32>
    %c0_2 = arith.constant 0 : index
    %c0_3 = arith.constant 0 : index
    %1 = vector.load %arg3[%c0_2, %c0_3] : memref<16x8xf32, #tpu.memory_space<vmem>>, vector<16x8xf32>
    %c0_4 = arith.constant 0 : index
    %c0_5 = arith.constant 0 : index
    %2 = vector.load %arg2[%c0_4, %c0_5] : memref<16x8xf32, #tpu.memory_space<vmem>>, vector<16x8xf32>
    %3 = vector.shape_cast %0 : vector<8x16x16xf32> to vector<128x16xf32>
    %cst = arith.constant dense<0.000000e+00> : vector<128x8xf32>
    %4 = tpu.matmul %3, %1, %cst {dimension_numbers = #tpu.dot_dimension_numbers<[1], [0], [0], [1], [0, 0, 1, 1], [], []>} : vector<128x16xf32>, vector<16x8xf32>, vector<128x8xf32> -> vector<128x8xf32>
    %5 = vector.shape_cast %4 : vector<128x8xf32> to vector<8x16x8xf32>
    %6 = tpu.transpose %5, [0, 2, 1] : vector<8x16x8xf32> -> vector<8x8x16xf32>
    %7 = vector.shape_cast %6 : vector<8x8x16xf32> to vector<64x16xf32>
    %cst_6 = arith.constant dense<0.000000e+00> : vector<64x8xf32>
    %8 = tpu.matmul %7, %2, %cst_6 {dimension_numbers = #tpu.dot_dimension_numbers<[1], [0], [0], [1], [0, 0, 1, 1], [], []>} : vector<64x16xf32>, vector<16x8xf32>, vector<64x8xf32> -> vector<64x8xf32>
    %9 = vector.shape_cast %8 : vector<64x8xf32> to vector<8x8x8xf32>
    %10 = tpu.transpose %9, [0, 2, 1] : vector<8x8x8xf32> -> vector<8x8x8xf32>
    %c0_7 = arith.constant 0 : index
    %c0_8 = arith.constant 0 : index
    %c0_9 = arith.constant 0 : index
    %11 = vector.load %arg6[%c0_7, %c0_8, %c0_9] : memref<8x8x8xf32, #tpu.memory_space<vmem>>, vector<8x8x8xf32>
    tpu.vector_store %arg6[%c0_7, %c0_8, %c0_9], %10 {strides = array<i32>} : memref<8x8x8xf32, #tpu.memory_space<vmem>>, vector<8x8x8xf32>,
    %c0_10 = arith.constant 0 : index
    %c0_11 = arith.constant 0 : index
    %12 = vector.load %arg5[%c0_10, %c0_11] : memref<8x4xf32, #tpu.memory_space<vmem>>, vector<8x4xf32>
    %c0_12 = arith.constant 0 : index
    %c0_13 = arith.constant 0 : index
    %13 = vector.load %arg4[%c0_12, %c0_13] : memref<4x8xf32, #tpu.memory_space<vmem>>, vector<4x8xf32>
    %14 = vector.shape_cast %10 : vector<8x8x8xf32> to vector<64x8xf32>
    %cst_14 = arith.constant dense<0.000000e+00> : vector<64x4xf32>
    %15 = tpu.matmul %14, %12, %cst_14 {dimension_numbers = #tpu.dot_dimension_numbers<[1], [0], [0], [1], [0, 0, 1, 1], [], []>} : vector<64x8xf32>, vector<8x4xf32>, vector<64x4xf32> -> vector<64x4xf32>
    %16 = vector.shape_cast %15 : vector<64x4xf32> to vector<8x8x4xf32>
    %17 = vector.shape_cast %13 : vector<4x8xf32> to vector<1x4x8xf32>
    %18 = vector.broadcast %17 : vector<1x4x8xf32> to vector<8x4x8xf32>
    "tpu.trace_start"() <{level = 10 : i32, message = "pik,pkj->pij"}> : () -> ()
    %cst_15 = arith.constant dense<0.000000e+00> : vector<8x4x4xf32>
    %19 = tpu.matmul %18, %16, %cst_15 {dimension_numbers = #tpu.dot_dimension_numbers<[2], [1], [1], [2], [0, 0, 0, 1, 1, 2], [0], [0]>} : vector<8x4x8xf32>, vector<8x8x4xf32>, vector<8x4x4xf32> -> vector<8x4x4xf32>
    "tpu.trace_stop"() : () -> ()
    %c0_16 = arith.constant 0 : index
    %c0_17 = arith.constant 0 : index
    %c0_18 = arith.constant 0 : index
    %20 = vector.load %arg7[%c0_16, %c0_17, %c0_18] : memref<8x4x4xf32, #tpu.memory_space<vmem>>, vector<8x4x4xf32>
    tpu.vector_store %arg7[%c0_16, %c0_17, %c0_18], %19 {strides = array<i32>} : memref<8x4x4xf32, #tpu.memory_space<vmem>>, vector<8x4x4xf32>,
    return
  }
  func.func @transform_0(%arg0: i32) -> (i32, i32, i32) {
    %c0_i32 = arith.constant 0 : i32
    %c0_i32_0 = arith.constant 0 : i32
    %c0_i32_1 = arith.constant 0 : i32
    return %arg0, %c0_i32, %c0_i32_0 : i32, i32, i32
  }
  func.func @transform_1(%arg0: i32) -> (i32, i32) {
    %c0_i32 = arith.constant 0 : i32
    %c0_i32_0 = arith.constant 0 : i32
    %c0_i32_1 = arith.constant 0 : i32
    return %c0_i32, %c0_i32_0 : i32, i32
  }
  func.func @transform_2(%arg0: i32) -> (i32, i32) {
    %c0_i32 = arith.constant 0 : i32
    %c0_i32_0 = arith.constant 0 : i32
    %c0_i32_1 = arith.constant 0 : i32
    return %c0_i32, %c0_i32_0 : i32, i32
  }
  func.func @transform_3(%arg0: i32) -> (i32, i32) {
    %c0_i32 = arith.constant 0 : i32
    %c0_i32_0 = arith.constant 0 : i32
    %c0_i32_1 = arith.constant 0 : i32
    return %c0_i32, %c0_i32_0 : i32, i32
  }
  func.func @transform_4(%arg0: i32) -> (i32, i32) {
    %c0_i32 = arith.constant 0 : i32
    %c0_i32_0 = arith.constant 0 : i32
    %c0_i32_1 = arith.constant 0 : i32
    return %c0_i32, %c0_i32_0 : i32, i32
  }
  func.func @transform_5(%arg0: i32) -> (i32, i32, i32) {
    %c0_i32 = arith.constant 0 : i32
    %c0_i32_0 = arith.constant 0 : i32
    %c0_i32_1 = arith.constant 0 : i32
    return %arg0, %c0_i32, %c0_i32_0 : i32, i32, i32
  }
  func.func @transform_6(%arg0: i32) -> (i32, i32, i32) {
    %c0_i32 = arith.constant 0 : i32
    %c0_i32_0 = arith.constant 0 : i32
    %c0_i32_1 = arith.constant 0 : i32
    return %arg0, %c0_i32, %c0_i32_0 : i32, i32, i32
  }
}

module attributes {stable_mosaic.version = 11 : i64} {
  func.func @kernel(%arg0: i32, %arg1: memref<8x16x16xf32, #tpu.memory_space<vmem>>, %arg2: memref<16x8xf32, #tpu.memory_space<vmem>>, %arg3: memref<16x8xf32, #tpu.memory_space<vmem>>, %arg4: memref<4x8xf32, #tpu.memory_space<vmem>>, %arg5: memref<8x4xf32, #tpu.memory_space<vmem>>, %arg6: memref<8x8x8xf32, #tpu.memory_space<vmem>>, %arg7: memref<8x4x4xf32, #tpu.memory_space<vmem>>) attributes {dimension_semantics = [#tpu.dimension_semantics<parallel>], iteration_bounds = array<i64: 1>, scalar_prefetch = 0 : i64, scratch_operands = 0 : i64, tpu.core_type = #tpu.core_type<tc>, window_params = [{transform_indices = @transform_0, window_bounds = array<i64: 8, 16, 16>}, {pipeline_mode = #tpu.pipeline_mode<synchronous>, transform_indices = @transform_1, window_bounds = array<i64: 16, 8>}, {pipeline_mode = #tpu.pipeline_mode<synchronous>, transform_indices = @transform_2, window_bounds = array<i64: 16, 8>}, {pipeline_mode = #tpu.pipeline_mode<synchronous>, transform_indices = @transform_3, window_bounds = array<i64: 4, 8>}, {pipeline_mode = #tpu.pipeline_mode<synchronous>, transform_indices = @transform_4, window_bounds = array<i64: 8, 4>}, {transform_indices = @transform_5, window_bounds = array<i64: 8, 8, 8>}, {transform_indices = @transform_6, window_bounds = array<i64: 8, 4, 4>}]} {
    %c0 = arith.constant 0 : index
    %c0_0 = arith.constant 0 : index
    %c0_1 = arith.constant 0 : index
    %0 = vector.load %arg1[%c0, %c0_0, %c0_1] : memref<8x16x16xf32, #tpu.memory_space<vmem>>, vector<8x16x16xf32>
    %c0_2 = arith.constant 0 : index
    %c0_3 = arith.constant 0 : index
    %1 = vector.load %arg3[%c0_2, %c0_3] : memref<16x8xf32, #tpu.memory_space<vmem>>, vector<16x8xf32>
    %c0_4 = arith.constant 0 : index
    %c0_5 = arith.constant 0 : index
    %2 = vector.load %arg2[%c0_4, %c0_5] : memref<16x8xf32, #tpu.memory_space<vmem>>, vector<16x8xf32>
    %3 = vector.shape_cast %0 : vector<8x16x16xf32> to vector<128x16xf32>
    %cst = arith.constant dense<0.000000e+00> : vector<128x8xf32>
    %4 = tpu.matmul %3, %1, %cst {dimension_numbers = #tpu.dot_dimension_numbers<[1], [0], [0], [1], [0, 0, 1, 1], [], []>} : vector<128x16xf32>, vector<16x8xf32>, vector<128x8xf32> -> vector<128x8xf32>
    %5 = vector.shape_cast %4 : vector<128x8xf32> to vector<8x16x8xf32>
    %6 = tpu.transpose %5, [0, 2, 1] : vector<8x16x8xf32> -> vector<8x8x16xf32>
    %7 = vector.shape_cast %6 : vector<8x8x16xf32> to vector<64x16xf32>
    %cst_6 = arith.constant dense<0.000000e+00> : vector<64x8xf32>
    %8 = tpu.matmul %7, %2, %cst_6 {dimension_numbers = #tpu.dot_dimension_numbers<[1], [0], [0], [1], [0, 0, 1, 1], [], []>} : vector<64x16xf32>, vector<16x8xf32>, vector<64x8xf32> -> vector<64x8xf32>
    %9 = vector.shape_cast %8 : vector<64x8xf32> to vector<8x8x8xf32>
    %10 = tpu.transpose %9, [0, 2, 1] : vector<8x8x8xf32> -> vector<8x8x8xf32>
    %c0_7 = arith.constant 0 : index
    %c0_8 = arith.constant 0 : index
    %c0_9 = arith.constant 0 : index
    %11 = vector.load %arg6[%c0_7, %c0_8, %c0_9] : memref<8x8x8xf32, #tpu.memory_space<vmem>>, vector<8x8x8xf32>
    tpu.vector_store %arg6[%c0_7, %c0_8, %c0_9], %10 {strides = array<i32>} : memref<8x8x8xf32, #tpu.memory_space<vmem>>, vector<8x8x8xf32>,
    %c0_10 = arith.constant 0 : index
    %c0_11 = arith.constant 0 : index
    %12 = vector.load %arg5[%c0_10, %c0_11] : memref<8x4xf32, #tpu.memory_space<vmem>>, vector<8x4xf32>
    %c0_12 = arith.constant 0 : index
    %c0_13 = arith.constant 0 : index
    %13 = vector.load %arg4[%c0_12, %c0_13] : memref<4x8xf32, #tpu.memory_space<vmem>>, vector<4x8xf32>
    %14 = vector.shape_cast %10 : vector<8x8x8xf32> to vector<64x8xf32>
    %cst_14 = arith.constant dense<0.000000e+00> : vector<64x4xf32>
    %15 = tpu.matmul %14, %12, %cst_14 {dimension_numbers = #tpu.dot_dimension_numbers<[1], [0], [0], [1], [0, 0, 1, 1], [], []>} : vector<64x8xf32>, vector<8x4xf32>, vector<64x4xf32> -> vector<64x4xf32>
    %16 = vector.shape_cast %15 : vector<64x4xf32> to vector<8x8x4xf32>
    %17 = vector.shape_cast %13 : vector<4x8xf32> to vector<1x4x8xf32>
    %18 = vector.broadcast %17 : vector<1x4x8xf32> to vector<8x4x8xf32>
    "tpu.trace_start"() <{level = 10 : i32, message = "pik,pkj->pij"}> : () -> ()
    %cst_15 = arith.constant dense<0.000000e+00> : vector<8x4x4xf32>
    %19 = tpu.matmul %18, %16, %cst_15 {dimension_numbers = #tpu.dot_dimension_numbers<[2], [1], [1], [2], [0, 0, 0, 1, 1, 2], [0], [0]>} : vector<8x4x8xf32>, vector<8x8x4xf32>, vector<8x4x4xf32> -> vector<8x4x4xf32>
    "tpu.trace_stop"() : () -> ()
    %c0_16 = arith.constant 0 : index
    %c0_17 = arith.constant 0 : index
    %c0_18 = arith.constant 0 : index
    %20 = vector.load %arg7[%c0_16, %c0_17, %c0_18] : memref<8x4x4xf32, #tpu.memory_space<vmem>>, vector<8x4x4xf32>
    tpu.vector_store %arg7[%c0_16, %c0_17, %c0_18], %19 {strides = array<i32>} : memref<8x4x4xf32, #tpu.memory_space<vmem>>, vector<8x4x4xf32>,
    return
  }
  func.func @transform_0(%arg0: i32) -> (i32, i32, i32) {
    %c0_i32 = arith.constant 0 : i32
    %c0_i32_0 = arith.constant 0 : i32
    %c0_i32_1 = arith.constant 0 : i32
    return %arg0, %c0_i32, %c0_i32_0 : i32, i32, i32
  }
  func.func @transform_1(%arg0: i32) -> (i32, i32) {
    %c0_i32 = arith.constant 0 : i32
    %c0_i32_0 = arith.constant 0 : i32
    %c0_i32_1 = arith.constant 0 : i32
    return %c0_i32, %c0_i32_0 : i32, i32
  }
  func.func @transform_2(%arg0: i32) -> (i32, i32) {
    %c0_i32 = arith.constant 0 : i32
    %c0_i32_0 = arith.constant 0 : i32
    %c0_i32_1 = arith.constant 0 : i32
    return %c0_i32, %c0_i32_0 : i32, i32
  }
  func.func @transform_3(%arg0: i32) -> (i32, i32) {
    %c0_i32 = arith.constant 0 : i32
    %c0_i32_0 = arith.constant 0 : i32
    %c0_i32_1 = arith.constant 0 : i32
    return %c0_i32, %c0_i32_0 : i32, i32
  }
  func.func @transform_4(%arg0: i32) -> (i32, i32) {
    %c0_i32 = arith.constant 0 : i32
    %c0_i32_0 = arith.constant 0 : i32
    %c0_i32_1 = arith.constant 0 : i32
    return %c0_i32, %c0_i32_0 : i32, i32
  }
  func.func @transform_5(%arg0: i32) -> (i32, i32, i32) {
    %c0_i32 = arith.constant 0 : i32
    %c0_i32_0 = arith.constant 0 : i32
    %c0_i32_1 = arith.constant 0 : i32
    return %arg0, %c0_i32, %c0_i32_0 : i32, i32, i32
  }
  func.func @transform_6(%arg0: i32) -> (i32, i32, i32) {
    %c0_i32 = arith.constant 0 : i32
    %c0_i32_0 = arith.constant 0 : i32
    %c0_i32_1 = arith.constant 0 : i32
    return %arg0, %c0_i32, %c0_i32_0 : i32, i32, i32
  }
}

module attributes {stable_mosaic.version = 11 : i64} {
  func.func @kernel(%arg0: i32, %arg1: memref<8x16x16xf32, #tpu.memory_space<vmem>>, %arg2: memref<8x16xf32, #tpu.memory_space<vmem>>, %arg3: memref<16x8xf32, #tpu.memory_space<vmem>>, %arg4: memref<4x8xf32, #tpu.memory_space<vmem>>, %arg5: memref<8x4xf32, #tpu.memory_space<vmem>>, %arg6: memref<8x8x8xf32, #tpu.memory_space<vmem>>, %arg7: memref<8x4x4xf32, #tpu.memory_space<vmem>>) attributes {dimension_semantics = [#tpu.dimension_semantics<parallel>], iteration_bounds = array<i64: 1>, scalar_prefetch = 0 : i64, scratch_operands = 0 : i64, tpu.core_type = #tpu.core_type<tc>, window_params = [{transform_indices = @transform_0, window_bounds = array<i64: 8, 16, 16>}, {pipeline_mode = #tpu.pipeline_mode<synchronous>, transform_indices = @transform_1, window_bounds = array<i64: 8, 16>}, {pipeline_mode = #tpu.pipeline_mode<synchronous>, transform_indices = @transform_2, window_bounds = array<i64: 16, 8>}, {pipeline_mode = #tpu.pipeline_mode<synchronous>, transform_indices = @transform_3, window_bounds = array<i64: 4, 8>}, {pipeline_mode = #tpu.pipeline_mode<synchronous>, transform_indices = @transform_4, window_bounds = array<i64: 8, 4>}, {transform_indices = @transform_5, window_bounds = array<i64: 8, 8, 8>}, {transform_indices = @transform_6, window_bounds = array<i64: 8, 4, 4>}]} {
    %c0 = arith.constant 0 : index
    %c0_0 = arith.constant 0 : index
    %c0_1 = arith.constant 0 : index
    %0 = vector.load %arg1[%c0, %c0_0, %c0_1] : memref<8x16x16xf32, #tpu.memory_space<vmem>>, vector<8x16x16xf32>
    %c0_2 = arith.constant 0 : index
    %c0_3 = arith.constant 0 : index
    %1 = vector.load %arg3[%c0_2, %c0_3] : memref<16x8xf32, #tpu.memory_space<vmem>>, vector<16x8xf32>
    %c0_4 = arith.constant 0 : index
    %c0_5 = arith.constant 0 : index
    %2 = vector.load %arg2[%c0_4, %c0_5] : memref<8x16xf32, #tpu.memory_space<vmem>>, vector<8x16xf32>
    %3 = vector.shape_cast %0 : vector<8x16x16xf32> to vector<128x16xf32>
    %cst = arith.constant dense<0.000000e+00> : vector<128x8xf32>
    %4 = tpu.matmul %3, %1, %cst {dimension_numbers = #tpu.dot_dimension_numbers<[1], [0], [0], [1], [0, 0, 1, 1], [], []>} : vector<128x16xf32>, vector<16x8xf32>, vector<128x8xf32> -> vector<128x8xf32>
    %5 = vector.shape_cast %4 : vector<128x8xf32> to vector<8x16x8xf32>
    %6 = vector.shape_cast %2 : vector<8x16xf32> to vector<1x8x16xf32>
    %7 = vector.broadcast %6 : vector<1x8x16xf32> to vector<8x8x16xf32>
    "tpu.trace_start"() <{level = 10 : i32, message = "pik,pkj->pij"}> : () -> ()
    %cst_6 = arith.constant dense<0.000000e+00> : vector<8x8x8xf32>
    %8 = tpu.matmul %7, %5, %cst_6 {dimension_numbers = #tpu.dot_dimension_numbers<[2], [1], [1], [2], [0, 0, 0, 1, 1, 2], [0], [0]>} : vector<8x8x16xf32>, vector<8x16x8xf32>, vector<8x8x8xf32> -> vector<8x8x8xf32>
    "tpu.trace_stop"() : () -> ()
    %c0_7 = arith.constant 0 : index
    %c0_8 = arith.constant 0 : index
    %c0_9 = arith.constant 0 : index
    %9 = vector.load %arg6[%c0_7, %c0_8, %c0_9] : memref<8x8x8xf32, #tpu.memory_space<vmem>>, vector<8x8x8xf32>
    tpu.vector_store %arg6[%c0_7, %c0_8, %c0_9], %8 {strides = array<i32>} : memref<8x8x8xf32, #tpu.memory_space<vmem>>, vector<8x8x8xf32>,
    %c0_10 = arith.constant 0 : index
    %c0_11 = arith.constant 0 : index
    %10 = vector.load %arg5[%c0_10, %c0_11] : memref<8x4xf32, #tpu.memory_space<vmem>>, vector<8x4xf32>
    %c0_12 = arith.constant 0 : index
    %c0_13 = arith.constant 0 : index
    %11 = vector.load %arg4[%c0_12, %c0_13] : memref<4x8xf32, #tpu.memory_space<vmem>>, vector<4x8xf32>
    %12 = vector.shape_cast %8 : vector<8x8x8xf32> to vector<64x8xf32>
    %cst_14 = arith.constant dense<0.000000e+00> : vector<64x4xf32>
    %13 = tpu.matmul %12, %10, %cst_14 {dimension_numbers = #tpu.dot_dimension_numbers<[1], [0], [0], [1], [0, 0, 1, 1], [], []>} : vector<64x8xf32>, vector<8x4xf32>, vector<64x4xf32> -> vector<64x4xf32>
    %14 = vector.shape_cast %13 : vector<64x4xf32> to vector<8x8x4xf32>
    %15 = vector.shape_cast %11 : vector<4x8xf32> to vector<1x4x8xf32>
    %16 = vector.broadcast %15 : vector<1x4x8xf32> to vector<8x4x8xf32>
    "tpu.trace_start"() <{level = 10 : i32, message = "pik,pkj->pij"}> : () -> ()
    %cst_15 = arith.constant dense<0.000000e+00> : vector<8x4x4xf32>
    %17 = tpu.matmul %16, %14, %cst_15 {dimension_numbers = #tpu.dot_dimension_numbers<[2], [1], [1], [2], [0, 0, 0, 1, 1, 2], [0], [0]>} : vector<8x4x8xf32>, vector<8x8x4xf32>, vector<8x4x4xf32> -> vector<8x4x4xf32>
    "tpu.trace_stop"() : () -> ()
    %c0_16 = arith.constant 0 : index
    %c0_17 = arith.constant 0 : index
    %c0_18 = arith.constant 0 : index
    %18 = vector.load %arg7[%c0_16, %c0_17, %c0_18] : memref<8x4x4xf32, #tpu.memory_space<vmem>>, vector<8x4x4xf32>
    tpu.vector_store %arg7[%c0_16, %c0_17, %c0_18], %17 {strides = array<i32>} : memref<8x4x4xf32, #tpu.memory_space<vmem>>, vector<8x4x4xf32>,
    return
  }
  func.func @transform_0(%arg0: i32) -> (i32, i32, i32) {
    %c0_i32 = arith.constant 0 : i32
    %c0_i32_0 = arith.constant 0 : i32
    %c0_i32_1 = arith.constant 0 : i32
    return %arg0, %c0_i32, %c0_i32_0 : i32, i32, i32
  }
  func.func @transform_1(%arg0: i32) -> (i32, i32) {
    %c0_i32 = arith.constant 0 : i32
    %c0_i32_0 = arith.constant 0 : i32
    %c0_i32_1 = arith.constant 0 : i32
    return %c0_i32, %c0_i32_0 : i32, i32
  }
  func.func @transform_2(%arg0: i32) -> (i32, i32) {
    %c0_i32 = arith.constant 0 : i32
    %c0_i32_0 = arith.constant 0 : i32
    %c0_i32_1 = arith.constant 0 : i32
    return %c0_i32, %c0_i32_0 : i32, i32
  }
  func.func @transform_3(%arg0: i32) -> (i32, i32) {
    %c0_i32 = arith.constant 0 : i32
    %c0_i32_0 = arith.constant 0 : i32
    %c0_i32_1 = arith.constant 0 : i32
    return %c0_i32, %c0_i32_0 : i32, i32
  }
  func.func @transform_4(%arg0: i32) -> (i32, i32) {
    %c0_i32 = arith.constant 0 : i32
    %c0_i32_0 = arith.constant 0 : i32
    %c0_i32_1 = arith.constant 0 : i32
    return %c0_i32, %c0_i32_0 : i32, i32
  }
  func.func @transform_5(%arg0: i32) -> (i32, i32, i32) {
    %c0_i32 = arith.constant 0 : i32
    %c0_i32_0 = arith.constant 0 : i32
    %c0_i32_1 = arith.constant 0 : i32
    return %arg0, %c0_i32, %c0_i32_0 : i32, i32, i32
  }
  func.func @transform_6(%arg0: i32) -> (i32, i32, i32) {
    %c0_i32 = arith.constant 0 : i32
    %c0_i32_0 = arith.constant 0 : i32
    %c0_i32_1 = arith.constant 0 : i32
    return %arg0, %c0_i32, %c0_i32_0 : i32, i32, i32
  }
}

</mosaic_0001>

<bundles_post_ra>
// kernel: fn.1
= control target key start
LH: loop header
LB: loop body
LE: loop exit
PB: predicated region body
PF: predicated region fallthrough
CT: control target
= control target key end

     0   :  { %12 = vsyncpa [#allocation3], 0  ;;  %s2156_s0 = inlined_call_operand.hbm [shape: f32[8,16,16], index: 0, kind: input, shape index: {}]   ;;  %s2157_s1 = inlined_call_operand.hbm [shape: f32[16,8], index: 1, kind: input, shape index: {}, may-alias: {1,2}]   ;;  %s2158_s2 = inlined_call_operand.hbm [shape: f32[16,8], index: 2, kind: input, shape index: {}, may-alias: {1,2}]   ;;  %s2159_s3 = inlined_call_operand.vmem [shape: f32[4,8], index: 3, kind: input, shape index: {}]   ;;  %s2160_s4 = inlined_call_operand.hbm [shape: f32[8,4], index: 4, kind: input, shape index: {}]   ;;  %s2161_s5 = inlined_call_operand.hbm [shape: f32[8,8,8], index: 5, kind: output, shape index: {0}]   ;;  %s2162_s6 = inlined_call_operand.hbm [shape: f32[8,4,4], index: 6, kind: output, shape index: {1}]  }
   0x1   :  { %13 = vsyncpa [#allocation6], 0 }
   0x2   :  { %14 = vsyncpa [#allocation9], 0 }
   0x3   :  { %15 = vsyncpa [#allocation4], 0 }
   0x4   :  { %16 = vsyncpa [#allocation12], 0  ;;  %s2012_s21 = smov [#allocation5]   ;;  %s2013_s23 = smov [#allocation2]  }
   0x5   :  { %s34_s22 = sshll.u32 %s2012_s21, 4  ;;  %s22_s24 = sshll.u32 %s2013_s23, 4  ;;  %s35_s22 = int_to_ptr.vmem [resolvable:$true] %s34_s22  ;;  %s23_s24 = int_to_ptr.vmem [resolvable:$true] %s22_s24 }
   0x6   :  { %s1890_s25 = scalar_lea.vmem %s35_s22, 256  ;;  %p1895_p1 = scmp.lt.s32.totalorder %s35_s22, %s35_s22 }
   0x7   :  { %p1891_p0 = scmp.ne.s32.totalorder %s35_s22, %s1890_s25  ;;  %p1896_p2 = scmp.lt.s32.totalorder %s1890_s25, %s1890_s25 }
   0x9   :  { %p1897_p3 = por %p1896_p2, %p1895_p1 }
   0xb   :  { %p1898_p4 = pnand %p1897_p3, %p1891_p0 }
   0xd   :  { %1901 = shalt.err (!%p1898_p4)
}
   0xe   :  { %s2014_s26 = smov 128   ;;  %s2015_s27 = smov 8  }
   0xf   :  { %40 = dma.hbm_to_vmem [thread:$0]  %s2157_s1, 256, %s35_s22, [#allocation6], %s2014_s26, %s2014_s26, %s2015_s27  }
  0x10   :  { %s1910_s30 = scalar_lea.vmem %s23_s24, 2048  ;;  %p1915_p6 = scmp.lt.s32.totalorder %s23_s24, %s23_s24 }
  0x11   :  { %p1911_p5 = scmp.ne.s32.totalorder %s23_s24, %s1910_s30  ;;  %p1916_p7 = scmp.lt.s32.totalorder %s1910_s30, %s1910_s30 }
  0x13   :  { %p1917_p8 = por %p1916_p7, %p1915_p6 }
  0x15   :  { %p1918_p9 = pnand %p1917_p8, %p1911_p5 }
  0x17   :  { %1921 = shalt.err (!%p1918_p9)
}
  0x18   :  { %28 = dma.hbm_to_vmem [thread:$0]  %s2156_s0, 2048, %s23_s24, [#allocation3], %s2014_s26, %s2014_s26, %s2015_s27  }
  0x19   :  { %s2016_s9 = smov [#allocation7]   ;;  %s2017_s11 = smov [#allocation8]  }
  0x1a   :  { %s46_s10 = sshll.u32 %s2016_s9, 4  ;;  %s61_s12 = sshll.u32 %s2017_s11, 4  ;;  %s47_s10 = int_to_ptr.vmem [resolvable:$true] %s46_s10  ;;  %s62_s12 = int_to_ptr.vmem [resolvable:$true] %s61_s12 }
  0x1b   :  { %s1930_s1 = scalar_lea.vmem %s47_s10, 256  ;;  %p1935_p11 = scmp.lt.s32.totalorder %s47_s10, %s47_s10 }
  0x1c   :  { %p1931_p10 = scmp.ne.s32.totalorder %s47_s10, %s1930_s1  ;;  %p1936_p12 = scmp.lt.s32.totalorder %s1930_s1, %s1930_s1 }
  0x1e   :  { %p1937_p13 = por %p1936_p12, %p1935_p11 }
  0x20   :  { %p1938_p0 = pnand %p1937_p13, %p1931_p10 }
  0x22   :  { %1941 = shalt.err (!%p1938_p0)
}
  0x23   :  { %52 = dma.hbm_to_vmem [thread:$0]  %s2158_s2, 256, %s47_s10, [#allocation6], %s2014_s26, %s2014_s26, %s2015_s27  }
  0x24   :  { %s1950_s0 = scalar_lea.vmem %s62_s12, 128  ;;  %p1955_p2 = scmp.lt.s32.totalorder %s62_s12, %s62_s12 }
  0x25   :  { %p1951_p1 = scmp.ne.s32.totalorder %s62_s12, %s1950_s0  ;;  %p1956_p3 = scmp.lt.s32.totalorder %s1950_s0, %s1950_s0 }
  0x27   :  { %p1957_p4 = por %p1956_p3, %p1955_p2 }
  0x29   :  { %p1958_p5 = pnand %p1957_p4, %p1951_p1 }
  0x2b   :  { %1961 = shalt.err (!%p1958_p5)
}
  0x2c   :  { %64 = dma.hbm_to_vmem [thread:$0]  %s2160_s4, 128, %s62_s12, [#allocation9]  }
  0x2d   :  { %2002 = dma.done.wait [#allocation3], 2048  }
  0x2e   :  { %2003 = vsyncadd [#allocation3], 4294965248 }
  0x2f   :  { %2004 = dma.done.wait [#allocation6], 512  }
  0x30   :  { %2005 = vsyncadd [#allocation6], 4294966784 }
  0x31   :  { %2006 = dma.done.wait [#allocation9], 128  }
  0x32   :  { %2007 = vsyncadd [#allocation9], 4294967168  ;;  %vm97_vm0 = vcmask 130048   ;;  %v94_v0 = vld [vmem:[#allocation7 + $0x8] sm:$0xff]  ;;  %v93_v1 = vld [vmem:[#allocation7] sm:$0xff]  ;;  %vm932_vm1 = vcmask 64512  }
  0x33   :  { %v77_v2 = vld [vmem:[#allocation2] sm:$0xff]  ;;  %1772 = vmatprep.subr.mxu0 %v94_v0  ;;  %v78_v3 = vld [vmem:[#allocation2 + $0x8] sm:$0xff]  ;;  %v79_v4 = vld [vmem:[#allocation2 + $0x10] sm:$0xff]  ;;  %v2018_v61 = vmov 0.0   ;;  %vm2019_vm2 = vmmov 0  }
  0x34   :  { %1776 = vmatprep.mubr.msk.f32.mxu0 %vm97_vm0, %v77_v2  ;;  %1773 = vmatpush3.msra.mxu0 %v94_v0  ;;  %v80_v5 = vld [vmem:[#allocation2 + $0x18] sm:$0xff]  ;;  %v81_v6 = vld [vmem:[#allocation2 + $0x20] sm:$0xff]  ;;  %v82_v7 = vld [vmem:[#allocation2 + $0x28] sm:$0xff] }
  0x35   :  { %1774 = vmatprep.subr.mxu0 %v93_v1  ;;  %v83_v8 = vld [vmem:[#allocation2 + $0x30] sm:$0xff]  ;;  %v84_v9 = vld [vmem:[#allocation2 + $0x38] sm:$0xff]  ;;  %v85_v10 = vld [vmem:[#allocation2 + $0x40] sm:$0xff] }
  0x36   :  { %1775 = vmatpush3.msra.mxu0 %v93_v1  ;;  %v86_v11 = vld [vmem:[#allocation2 + $0x48] sm:$0xff]  ;;  %v87_v12 = vld [vmem:[#allocation2 + $0x50] sm:$0xff]  ;;  %v88_v13 = vld [vmem:[#allocation2 + $0x58] sm:$0xff] }
  0x37   :  { %1777 = vmatmul.mubr.msk.f32.vlgmr.msra.gmra.mxu0 %vm97_vm0, %v78_v3  ;;  %v89_v14 = vld [vmem:[#allocation2 + $0x60] sm:$0xff]  ;;  %v90_v15 = vld [vmem:[#allocation2 + $0x68] sm:$0xff]  ;;  %v91_v16 = vld [vmem:[#allocation2 + $0x70] sm:$0xff]  ;;  %1830 = vmatprep.subr.mxu0 %v2018_v61 }
  0x38   :  { %1779 = vmatprep.mubr.msk.f32.mxu0 %vm97_vm0, %v79_v4  ;;  %v92_v17 = vld [vmem:[#allocation2 + $0x78] sm:$0xff]  ;;  %v96_v18 = vld [vmem:[#allocation5 + $0x8] sm:$0xff]  ;;  %v95_v19 = vld [vmem:[#allocation5] sm:$0xff] }
  0x39   :  { %1800 = vmatprep.subr.mxu1 %v96_v18  ;;  %v941_v44 = vld [vmem:[#allocation8] sm:$0xff] }
  0x3a   :  { %1801 = vmatpush3.msra.mxu1 %v96_v18  ;;  %v942_v62 = vld [vmem:[%s2159_s3] sm:$0xf]  ;;  %s2020_s3 = smov [#allocation10]  }
  0x3b   :  { %1780 = vmatmul.mubr.msk.f32.gmra.mxu0 %vm97_vm0, %v80_v5  ;;  %1802 = vmatprep.subr.mxu1 %v95_v19  ;;  %s1649_s17 = sshll.u32 %s2020_s3, 4  ;;  %s1650_s17 = int_to_ptr.vmem [resolvable:$true] %s1649_s17 }
  0x3c   :  { %1782 = vmatprep.mubr.msk.f32.mxu0 %vm97_vm0, %v81_v6  ;;  %1803 = vmatpush3.msra.mxu1 %v95_v19  ;;  %s1962_s18 = scalar_lea.vmem %s1650_s17, 1024  ;;  %p1967_p7 = scmp.lt.s32.totalorder %s1650_s17, %s1650_s17 }
  0x3d   :  { %1816 = vmatprep.subr.mxu1 %v941_v44  ;;  %p1963_p6 = scmp.ne.s32.totalorder %s1650_s17, %s1962_s18  ;;  %p1968_p8 = scmp.lt.s32.totalorder %s1962_s18, %s1962_s18 }
  0x3f   :  { %1783 = vmatmul.mubr.msk.f32.gmra.mxu0 %vm97_vm0, %v82_v7  ;;  %p1969_p9 = por %p1968_p8, %p1967_p7 }
  0x40   :  { %1785 = vmatprep.mubr.msk.f32.mxu0 %vm97_vm0, %v83_v8 }
  0x41   :  { %p1970_p10 = pnand %p1969_p9, %p1963_p6 }
  0x43   :  { %1786 = vmatmul.mubr.msk.f32.gmra.mxu0 %vm97_vm0, %v84_v9 }
  0x44   :  { %1788 = vmatprep.mubr.msk.f32.mxu0 %vm97_vm0, %v85_v10 }
  0x47   :  { %1789 = vmatmul.mubr.msk.f32.gmra.mxu0 %vm97_vm0, %v86_v11 }
  0x48   :  { %1791 = vmatprep.mubr.msk.f32.mxu0 %vm97_vm0, %v87_v12 }
  0x4b   :  { %1792 = vmatmul.mubr.msk.f32.gmra.mxu0 %vm97_vm0, %v88_v13 }
  0x4c   :  { %1794 = vmatprep.mubr.msk.f32.mxu0 %vm97_vm0, %v89_v14 }
  0x4f   :  { %1795 = vmatmul.mubr.msk.f32.gmra.mxu0 %vm97_vm0, %v90_v15 }
  0x50   :  { %1797 = vmatprep.mubr.msk.f32.mxu0 %vm97_vm0, %v91_v16 }
  0x53   :  { %1798 = vmatmul.mubr.msk.f32.gmra.mxu0 %vm97_vm0, %v92_v17 }
  0x54   :  { %1832 = vmatprep.mubr.msk.f32.mxu0 %vm2019_vm2, %v2018_v61 }
  0xf7   :  { %v1778_v20 = vpop.f32.mrf.mxu0 }
  0xf9   :  { %v212_v21 = vpop.f32.mrf.mxu0 }
  0xfa   :  { %291 = vxpose.xlu0.b32.start [1/2] (short) (narrow) %v212_v21, 8 }
  0xfb   :  { %v1781_v22 = vpop.f32.mrf.mxu0 }
  0xfd   :  { %v222_v23 = vpop.f32.mrf.mxu0 }
  0xfe   :  { %292 = vxpose.xlu0.b32.end [2/2] (short) (narrow) %v1778_v20, 8  ;;  %323 = vxpose.xlu1.b32.start [1/2] (short) (narrow) %v222_v23, 8 }
  0xff   :  { %v1784_v24 = vpop.f32.mrf.mxu0 }
 0x101   :  { %v232_v25 = vpop.f32.mrf.mxu0 }
 0x102   :  { %324 = vxpose.xlu1.b32.end [2/2] (short) (narrow) %v1781_v22, 8  ;;  %355 = vxpose.xlu0.b32.start [1/2] (short) (narrow) %v232_v25, 8 }
 0x103   :  { %v1787_v26 = vpop.f32.mrf.mxu0 }
 0x105   :  { %v242_v27 = vpop.f32.mrf.mxu0 }
 0x106   :  { %356 = vxpose.xlu0.b32.end [2/2] (short) (narrow) %v1784_v24, 8  ;;  %387 = vxpose.xlu1.b32.start [1/2] (short) (narrow) %v242_v27, 8 }
 0x107   :  { %v1790_v28 = vpop.f32.mrf.mxu0 }
 0x109   :  { %v252_v29 = vpop.f32.mrf.mxu0 }
 0x10a   :  { %388 = vxpose.xlu1.b32.end [2/2] (short) (narrow) %v1787_v26, 8  ;;  %419 = vxpose.xlu0.b32.start [1/2] (short) (narrow) %v252_v29, 8 }
 0x10b   :  { %v1793_v30 = vpop.f32.mrf.mxu0 }
 0x10d   :  { %v262_v31 = vpop.f32.mrf.mxu0 }
 0x10e   :  { %420 = vxpose.xlu0.b32.end [2/2] (short) (narrow) %v1790_v28, 8  ;;  %451 = vxpose.xlu1.b32.start [1/2] (short) (narrow) %v262_v31, 8 }
 0x10f   :  { %v1796_v32 = vpop.f32.mrf.mxu0 }
 0x111   :  { %v272_v33 = vpop.f32.mrf.mxu0 }
 0x112   :  { %452 = vxpose.xlu1.b32.end [2/2] (short) (narrow) %v1793_v30, 8  ;;  %483 = vxpose.xlu0.b32.start [1/2] (short) (narrow) %v272_v33, 8 }
 0x113   :  { %v1799_v34 = vpop.f32.mrf.mxu0 }
 0x115   :  { %v282_v35 = vpop.f32.mrf.mxu0 }
 0x116   :  { %484 = vxpose.xlu0.b32.end [2/2] (short) (narrow) %v1796_v32, 8  ;;  %515 = vxpose.xlu1.b32.start [1/2] (short) (narrow) %v282_v35, 8 }
 0x11a   :  { %516 = vxpose.xlu1.b32.end [2/2] (short) (narrow) %v1799_v34, 8 }
 0x176   :  { %v307_v36 = vpop.trf.xlu0 }
 0x177   :  { %1804 = vmatprep.mubr.msk.f32.mxu1 %vm97_vm0, %v307_v36 }
 0x17a   :  { %v339_v37 = vpop.trf.xlu1 }
 0x17b   :  { %1805 = vmatmul.mubr.msk.f32.vlgmr.msra.gmra.mxu1 %vm97_vm0, %v339_v37 }
 0x17c   :  { %1817 = vmatpush3.msra.mxu1 %v941_v44 }
 0x17d   :  { %1835 = vmatprep.subr.mxu1 %v2018_v61 }
 0x17e   :  { %v371_v38 = vpop.trf.xlu0 }
 0x17f   :  { %1807 = vmatprep.mubr.msk.f32.mxu1 %vm97_vm0, %v371_v38 }
 0x182   :  { %v403_v39 = vpop.trf.xlu1 }
 0x183   :  { %1808 = vmatmul.mubr.msk.f32.gmra.mxu1 %vm97_vm0, %v403_v39 }
 0x186   :  { %v435_v40 = vpop.trf.xlu0 }
 0x187   :  { %1810 = vmatprep.mubr.msk.f32.mxu1 %vm97_vm0, %v435_v40 }
 0x18a   :  { %v467_v41 = vpop.trf.xlu1 }
 0x18b   :  { %1811 = vmatmul.mubr.msk.f32.gmra.mxu1 %vm97_vm0, %v467_v41 }
 0x18e   :  { %v499_v42 = vpop.trf.xlu0 }
 0x18f   :  { %1813 = vmatprep.mubr.msk.f32.mxu1 %vm97_vm0, %v499_v42 }
 0x192   :  { %v531_v43 = vpop.trf.xlu1 }
 0x193   :  { %1814 = vmatmul.mubr.msk.f32.gmra.mxu1 %vm97_vm0, %v531_v43 }
 0x23b   :  { %v1806_v45 = vpop.f32.mrf.mxu1 }
 0x23c   :  { %708 = vxpose.xlu1.b32.start.end [1/1] (short) (narrow) %v1806_v45, 8 }
 0x23d   :  { %v637_v46 = vpop.f32.mrf.mxu1 }
 0x23e   :  { %676 = vxpose.xlu0.b32.start.end [1/1] (short) (narrow) %v637_v46, 8 }
 0x243   :  { %v1809_v47 = vpop.f32.mrf.mxu1 }
 0x244   :  { %772 = vxpose.xlu1.b32.start.end [1/1] (short) (narrow) %v1809_v47, 8 }
 0x245   :  { %v647_v48 = vpop.f32.mrf.mxu1 }
 0x246   :  { %740 = vxpose.xlu0.b32.start.end [1/1] (short) (narrow) %v647_v48, 8 }
 0x24b   :  { %v1812_v49 = vpop.f32.mrf.mxu1 }
 0x24c   :  { %836 = vxpose.xlu1.b32.start.end [1/1] (short) (narrow) %v1812_v49, 8 }
 0x24d   :  { %v657_v50 = vpop.f32.mrf.mxu1 }
 0x24e   :  { %804 = vxpose.xlu0.b32.start.end [1/1] (short) (narrow) %v657_v50, 8 }
 0x253   :  { %v1815_v51 = vpop.f32.mrf.mxu1 }
 0x254   :  { %900 = vxpose.xlu1.b32.start.end [1/1] (short) (narrow) %v1815_v51, 8 }
 0x255   :  { %v667_v52 = vpop.f32.mrf.mxu1 }
 0x256   :  { %868 = vxpose.xlu0.b32.start.end [1/1] (short) (narrow) %v667_v52, 8 }
 0x2b8   :  { %v724_v53 = vpop.trf.xlu1 }
 0x2b9   :  { %934 = vst.msk [vmem:[#allocation10 + $0x8] sm:$0xff] %vm932_vm1, %v724_v53 }
 0x2ba   :  { %v692_v54 = vpop.trf.xlu0 }
 0x2bb   :  { %933 = vst.msk [vmem:[#allocation10] sm:$0xff] %vm932_vm1, %v692_v54  ;;  %1818 = vmatprep.mubr.msk.f32.mxu1 %vm932_vm1, %v692_v54 }
 0x2bc   :  { %1819 = vmatmul.mubr.msk.f32.vlgmr.msra.gmra.mxu1 %vm932_vm1, %v724_v53 }
 0x2c0   :  { %v788_v55 = vpop.trf.xlu1 }
 0x2c1   :  { %936 = vst.msk [vmem:[#allocation10 + $0x18] sm:$0xff] %vm932_vm1, %v788_v55 }
 0x2c2   :  { %v756_v56 = vpop.trf.xlu0 }
 0x2c3   :  { %935 = vst.msk [vmem:[#allocation10 + $0x10] sm:$0xff] %vm932_vm1, %v756_v56  ;;  %1821 = vmatprep.mubr.msk.f32.mxu1 %vm932_vm1, %v756_v56 }
 0x2c4   :  { %1822 = vmatmul.mubr.msk.f32.gmra.mxu1 %vm932_vm1, %v788_v55 }
 0x2c8   :  { %v852_v57 = vpop.trf.xlu1 }
 0x2c9   :  { %938 = vst.msk [vmem:[#allocation10 + $0x28] sm:$0xff] %vm932_vm1, %v852_v57 }
 0x2ca   :  { %v820_v58 = vpop.trf.xlu0 }
 0x2cb   :  { %937 = vst.msk [vmem:[#allocation10 + $0x20] sm:$0xff] %vm932_vm1, %v820_v58  ;;  %1824 = vmatprep.mubr.msk.f32.mxu1 %vm932_vm1, %v820_v58 }
 0x2cc   :  { %1825 = vmatmul.mubr.msk.f32.gmra.mxu1 %vm932_vm1, %v852_v57 }
 0x2d0   :  { %v916_v59 = vpop.trf.xlu1 }
 0x2d1   :  { %940 = vst.msk [vmem:[#allocation10 + $0x38] sm:$0xff] %vm932_vm1, %v916_v59 }
 0x2d2   :  { %v884_v60 = vpop.trf.xlu0 }
 0x2d3   :  { %939 = vst.msk [vmem:[#allocation10 + $0x30] sm:$0xff] %vm932_vm1, %v884_v60  ;;  %1827 = vmatprep.mubr.msk.f32.mxu1 %vm932_vm1, %v884_v60 }
 0x2d4   :  { %1828 = vmatmul.mubr.msk.f32.gmra.mxu1 %vm932_vm1, %v916_v59 }
 0x2d5   :  { %1837 = vmatprep.mubr.msk.f32.mxu1 %vm2019_vm2, %v2018_v61 }
 0x37c   :  { %v1820_v63 = vpop.f32.mrf.mxu1 }
 0x37d   :  { %1836 = vmatpush3.msra.mxu1 %v1820_v63 }
 0x37e   :  { %v1033_v0 = vpop.f32.mrf.mxu1  ;;  %1845 = vmatprep.subr.mxu1 %v2018_v61  ;;  %1838 = vmatmul.mubr.msk.f32.vlgmr.msra.gmra.mxu1 %vm932_vm1, %v942_v62 }
 0x37f   :  { %1831 = vmatpush3.msra.mxu0 %v1033_v0  ;;  %1847 = vmatprep.mubr.msk.f32.mxu1 %vm2019_vm2, %v2018_v61 }
 0x380   :  { %1840 = vmatprep.subr.mxu0 %v2018_v61  ;;  %1833 = vmatmul.mubr.msk.f32.vlgmr.msra.gmra.mxu0 %vm932_vm1, %v942_v62 }
 0x381   :  { %1842 = vmatprep.mubr.msk.f32.mxu0 %vm2019_vm2, %v2018_v61 }
 0x384   :  { %v1823_v1 = vpop.f32.mrf.mxu1 }
 0x385   :  { %1846 = vmatpush3.msra.mxu1 %v1823_v1 }
 0x386   :  { %v1043_v2 = vpop.f32.mrf.mxu1  ;;  %1855 = vmatprep.subr.mxu1 %v2018_v61  ;;  %1848 = vmatmul.mubr.msk.f32.vlgmr.msra.gmra.mxu1 %vm932_vm1, %v942_v62 }
 0x387   :  { %1841 = vmatpush3.msra.mxu0 %v1043_v2  ;;  %1857 = vmatprep.mubr.msk.f32.mxu1 %vm2019_vm2, %v2018_v61 }
 0x388   :  { %1850 = vmatprep.subr.mxu0 %v2018_v61  ;;  %1843 = vmatmul.mubr.msk.f32.vlgmr.msra.gmra.mxu0 %vm932_vm1, %v942_v62 }
 0x389   :  { %1852 = vmatprep.mubr.msk.f32.mxu0 %vm2019_vm2, %v2018_v61 }
 0x38c   :  { %v1826_v3 = vpop.f32.mrf.mxu1 }
 0x38d   :  { %1856 = vmatpush3.msra.mxu1 %v1826_v3 }
 0x38e   :  { %v1053_v4 = vpop.f32.mrf.mxu1  ;;  %1865 = vmatprep.subr.mxu1 %v2018_v61  ;;  %1858 = vmatmul.mubr.msk.f32.vlgmr.msra.gmra.mxu1 %vm932_vm1, %v942_v62 }
 0x38f   :  { %1851 = vmatpush3.msra.mxu0 %v1053_v4  ;;  %1867 = vmatprep.mubr.msk.f32.mxu1 %vm2019_vm2, %v2018_v61 }
 0x390   :  { %1860 = vmatprep.subr.mxu0 %v2018_v61  ;;  %1853 = vmatmul.mubr.msk.f32.vlgmr.msra.gmra.mxu0 %vm932_vm1, %v942_v62 }
 0x391   :  { %1862 = vmatprep.mubr.msk.f32.mxu0 %vm2019_vm2, %v2018_v61 }
 0x394   :  { %v1829_v5 = vpop.f32.mrf.mxu1 }
 0x395   :  { %1866 = vmatpush3.msra.mxu1 %v1829_v5 }
 0x396   :  { %v1063_v6 = vpop.f32.mrf.mxu1  ;;  %1868 = vmatmul.mubr.msk.f32.vlgmr.msra.gmra.mxu1 %vm932_vm1, %v942_v62 }
 0x397   :  { %1861 = vmatpush3.msra.mxu0 %v1063_v6 }
 0x398   :  { %1863 = vmatmul.mubr.msk.f32.vlgmr.msra.gmra.mxu0 %vm932_vm1, %v942_v62 }
 0x399   :  { %1973 = shalt.err (!%p1970_p10)
}
 0x39a   :  { %1655 = dma.vmem_to_hbm [thread:$0]  %s1650_s17, 1024, %s2161_s5, [#allocation4], %s2014_s26, %s2014_s26, %s2015_s27   ;;  %vm1635_vm3 = vcmask 27648  }
 0x39b   :  { %s2021_s5 = smov [#allocation11]  }
 0x39c   :  { %s1661_s21 = sshll.u32 %s2021_s5, 4  ;;  %s1662_s21 = int_to_ptr.vmem [resolvable:$true] %s1661_s21 }
 0x39d   :  { %s1982_s22 = scalar_lea.vmem %s1662_s21, 512  ;;  %p1987_p12 = scmp.lt.s32.totalorder %s1662_s21, %s1662_s21 }
 0x39e   :  { %p1983_p11 = scmp.ne.s32.totalorder %s1662_s21, %s1982_s22  ;;  %p1988_p13 = scmp.lt.s32.totalorder %s1982_s22, %s1982_s22 }
 0x3a0   :  { %p1989_p0 = por %p1988_p13, %p1987_p12 }
 0x3a2   :  { %p1990_p1 = pnand %p1989_p0, %p1983_p11 }
 0x43e   :  { %v1211_v7 = vpop.f32.mrf.mxu1 }
 0x43f   :  { %1637 = vst.msk [vmem:[#allocation11 + $0x4] sm:$0xf] %vm1635_vm3, %v1211_v7 }
 0x440   :  { %v1141_v8 = vpop.f32.mrf.mxu0  ;;  %v1839_v9 = vpop.f32.mrf.mxu1 }
 0x441   :  { %1636 = vst.msk [vmem:[#allocation11] sm:$0xf] %vm1635_vm3, %v1141_v8 }
 0x442   :  { %v1834_v10 = vpop.f32.mrf.mxu0 }
 0x446   :  { %v1351_v11 = vpop.f32.mrf.mxu1 }
 0x447   :  { %1639 = vst.msk [vmem:[#allocation11 + $0xc] sm:$0xf] %vm1635_vm3, %v1351_v11 }
 0x448   :  { %v1281_v12 = vpop.f32.mrf.mxu0  ;;  %v1849_v13 = vpop.f32.mrf.mxu1 }
 0x449   :  { %1638 = vst.msk [vmem:[#allocation11 + $0x8] sm:$0xf] %vm1635_vm3, %v1281_v12 }
 0x44a   :  { %v1844_v14 = vpop.f32.mrf.mxu0 }
 0x44e   :  { %v1491_v15 = vpop.f32.mrf.mxu1 }
 0x44f   :  { %1641 = vst.msk [vmem:[#allocation11 + $0x14] sm:$0xf] %vm1635_vm3, %v1491_v15 }
 0x450   :  { %v1421_v16 = vpop.f32.mrf.mxu0  ;;  %v1859_v17 = vpop.f32.mrf.mxu1 }
 0x451   :  { %1640 = vst.msk [vmem:[#allocation11 + $0x10] sm:$0xf] %vm1635_vm3, %v1421_v16 }
 0x452   :  { %v1854_v18 = vpop.f32.mrf.mxu0 }
 0x456   :  { %v1631_v19 = vpop.f32.mrf.mxu1 }
 0x457   :  { %1643 = vst.msk [vmem:[#allocation11 + $0x1c] sm:$0xf] %vm1635_vm3, %v1631_v19 }
 0x458   :  { %v1561_v20 = vpop.f32.mrf.mxu0  ;;  %v1869_v21 = vpop.f32.mrf.mxu1 }
 0x459   :  { %1642 = vst.msk [vmem:[#allocation11 + $0x18] sm:$0xf] %vm1635_vm3, %v1561_v20 }
 0x45a   :  { %v1864_v22 = vpop.f32.mrf.mxu0 }
 0x45b   :  { %1993 = shalt.err (!%p1990_p1)
}
 0x45c   :  { %s2022_s23 = smov 64   ;;  %s2023_s24 = smov 4  }
 0x45d   :  { %1667 = dma.vmem_to_hbm [thread:$0]  %s1662_s21, 512, %s2162_s6, [#allocation12], %s2022_s23, %s2022_s23, %s2023_s24  }
 0x45e   :  { %2008 = dma.done.wait [#allocation4], 1024  }
 0x45f   :  { %2009 = vsyncadd [#allocation4], 4294966272 }
 0x460   :  { %2010 = dma.done.wait [#allocation12], 512  }
 0x461   :  { %2011 = vsyncadd [#allocation12], 4294966784 }
 0x462   :  { %1674 = vsyncpa [#allocation3], 1 }
 0x463   :  { %1675 = vsyncpa [#allocation6], 1 }
 0x464   :  { %1676 = vsyncpa [#allocation9], 1 }
 0x465   :  { %1677 = vsyncpa [#allocation4], 1 }
 0x466   :  { %1678 = vsyncpa [#allocation12], 1 }

// kernel: fn.1
= control target key start
LH: loop header
LB: loop body
LE: loop exit
PB: predicated region body
PF: predicated region fallthrough
CT: control target
= control target key end

     0   :  { %12 = vsyncpa [#allocation3], 0  ;;  %s2156_s0 = inlined_call_operand.hbm [shape: f32[8,16,16], index: 0, kind: input, shape index: {}]   ;;  %s2157_s1 = inlined_call_operand.hbm [shape: f32[16,8], index: 1, kind: input, shape index: {}, may-alias: {1,2}]   ;;  %s2158_s2 = inlined_call_operand.hbm [shape: f32[16,8], index: 2, kind: input, shape index: {}, may-alias: {1,2}]   ;;  %s2159_s3 = inlined_call_operand.vmem [shape: f32[4,8], index: 3, kind: input, shape index: {}]   ;;  %s2160_s4 = inlined_call_operand.hbm [shape: f32[8,4], index: 4, kind: input, shape index: {}]   ;;  %s2161_s5 = inlined_call_operand.hbm [shape: f32[8,8,8], index: 5, kind: output, shape index: {0}]   ;;  %s2162_s6 = inlined_call_operand.hbm [shape: f32[8,4,4], index: 6, kind: output, shape index: {1}]  }
   0x1   :  { %13 = vsyncpa [#allocation6], 0 }
   0x2   :  { %14 = vsyncpa [#allocation9], 0 }
   0x3   :  { %15 = vsyncpa [#allocation4], 0 }
   0x4   :  { %16 = vsyncpa [#allocation12], 0  ;;  %s2012_s21 = smov [#allocation5]   ;;  %s2013_s23 = smov [#allocation2]  }
   0x5   :  { %s34_s22 = sshll.u32 %s2012_s21, 4  ;;  %s22_s24 = sshll.u32 %s2013_s23, 4  ;;  %s35_s22 = int_to_ptr.vmem [resolvable:$true] %s34_s22  ;;  %s23_s24 = int_to_ptr.vmem [resolvable:$true] %s22_s24 }
   0x6   :  { %s1890_s25 = scalar_lea.vmem %s35_s22, 256  ;;  %p1895_p1 = scmp.lt.s32.totalorder %s35_s22, %s35_s22 }
   0x7   :  { %p1891_p0 = scmp.ne.s32.totalorder %s35_s22, %s1890_s25  ;;  %p1896_p2 = scmp.lt.s32.totalorder %s1890_s25, %s1890_s25 }
   0x9   :  { %p1897_p3 = por %p1896_p2, %p1895_p1 }
   0xb   :  { %p1898_p4 = pnand %p1897_p3, %p1891_p0 }
   0xd   :  { %1901 = shalt.err (!%p1898_p4)
}
   0xe   :  { %s2014_s26 = smov 128   ;;  %s2015_s27 = smov 8  }
   0xf   :  { %40 = dma.hbm_to_vmem [thread:$0]  %s2157_s1, 256, %s35_s22, [#allocation6], %s2014_s26, %s2014_s26, %s2015_s27  }
  0x10   :  { %s1910_s30 = scalar_lea.vmem %s23_s24, 2048  ;;  %p1915_p6 = scmp.lt.s32.totalorder %s23_s24, %s23_s24 }
  0x11   :  { %p1911_p5 = scmp.ne.s32.totalorder %s23_s24, %s1910_s30  ;;  %p1916_p7 = scmp.lt.s32.totalorder %s1910_s30, %s1910_s30 }
  0x13   :  { %p1917_p8 = por %p1916_p7, %p1915_p6 }
  0x15   :  { %p1918_p9 = pnand %p1917_p8, %p1911_p5 }
  0x17   :  { %1921 = shalt.err (!%p1918_p9)
}
  0x18   :  { %28 = dma.hbm_to_vmem [thread:$0]  %s2156_s0, 2048, %s23_s24, [#allocation3], %s2014_s26, %s2014_s26, %s2015_s27  }
  0x19   :  { %s2016_s9 = smov [#allocation7]   ;;  %s2017_s11 = smov [#allocation8]  }
  0x1a   :  { %s46_s10 = sshll.u32 %s2016_s9, 4  ;;  %s61_s12 = sshll.u32 %s2017_s11, 4  ;;  %s47_s10 = int_to_ptr.vmem [resolvable:$true] %s46_s10  ;;  %s62_s12 = int_to_ptr.vmem [resolvable:$true] %s61_s12 }
  0x1b   :  { %s1930_s1 = scalar_lea.vmem %s47_s10, 256  ;;  %p1935_p11 = scmp.lt.s32.totalorder %s47_s10, %s47_s10 }
  0x1c   :  { %p1931_p10 = scmp.ne.s32.totalorder %s47_s10, %s1930_s1  ;;  %p1936_p12 = scmp.lt.s32.totalorder %s1930_s1, %s1930_s1 }
  0x1e   :  { %p1937_p13 = por %p1936_p12, %p1935_p11 }
  0x20   :  { %p1938_p0 = pnand %p1937_p13, %p1931_p10 }
  0x22   :  { %1941 = shalt.err (!%p1938_p0)
}
  0x23   :  { %52 = dma.hbm_to_vmem [thread:$0]  %s2158_s2, 256, %s47_s10, [#allocation6], %s2014_s26, %s2014_s26, %s2015_s27  }
  0x24   :  { %s1950_s0 = scalar_lea.vmem %s62_s12, 128  ;;  %p1955_p2 = scmp.lt.s32.totalorder %s62_s12, %s62_s12 }
  0x25   :  { %p1951_p1 = scmp.ne.s32.totalorder %s62_s12, %s1950_s0  ;;  %p1956_p3 = scmp.lt.s32.totalorder %s1950_s0, %s1950_s0 }
  0x27   :  { %p1957_p4 = por %p1956_p3, %p1955_p2 }
  0x29   :  { %p1958_p5 = pnand %p1957_p4, %p1951_p1 }
  0x2b   :  { %1961 = shalt.err (!%p1958_p5)
}
  0x2c   :  { %64 = dma.hbm_to_vmem [thread:$0]  %s2160_s4, 128, %s62_s12, [#allocation9]  }
  0x2d   :  { %2002 = dma.done.wait [#allocation3], 2048  }
  0x2e   :  { %2003 = vsyncadd [#allocation3], 4294965248 }
  0x2f   :  { %2004 = dma.done.wait [#allocation6], 512  }
  0x30   :  { %2005 = vsyncadd [#allocation6], 4294966784 }
  0x31   :  { %2006 = dma.done.wait [#allocation9], 128  }
  0x32   :  { %2007 = vsyncadd [#allocation9], 4294967168  ;;  %vm97_vm0 = vcmask 130048   ;;  %v94_v0 = vld [vmem:[#allocation7 + $0x8] sm:$0xff]  ;;  %v93_v1 = vld [vmem:[#allocation7] sm:$0xff]  ;;  %vm932_vm1 = vcmask 64512  }
  0x33   :  { %v77_v2 = vld [vmem:[#allocation2] sm:$0xff]  ;;  %1772 = vmatprep.subr.mxu0 %v94_v0  ;;  %v78_v3 = vld [vmem:[#allocation2 + $0x8] sm:$0xff]  ;;  %v79_v4 = vld [vmem:[#allocation2 + $0x10] sm:$0xff]  ;;  %v2018_v61 = vmov 0.0   ;;  %vm2019_vm2 = vmmov 0  }
  0x34   :  { %1776 = vmatprep.mubr.msk.f32.mxu0 %vm97_vm0, %v77_v2  ;;  %1773 = vmatpush3.msra.mxu0 %v94_v0  ;;  %v80_v5 = vld [vmem:[#allocation2 + $0x18] sm:$0xff]  ;;  %v81_v6 = vld [vmem:[#allocation2 + $0x20] sm:$0xff]  ;;  %v82_v7 = vld [vmem:[#allocation2 + $0x28] sm:$0xff] }
  0x35   :  { %1774 = vmatprep.subr.mxu0 %v93_v1  ;;  %v83_v8 = vld [vmem:[#allocation2 + $0x30] sm:$0xff]  ;;  %v84_v9 = vld [vmem:[#allocation2 + $0x38] sm:$0xff]  ;;  %v85_v10 = vld [vmem:[#allocation2 + $0x40] sm:$0xff] }
  0x36   :  { %1775 = vmatpush3.msra.mxu0 %v93_v1  ;;  %v86_v11 = vld [vmem:[#allocation2 + $0x48] sm:$0xff]  ;;  %v87_v12 = vld [vmem:[#allocation2 + $0x50] sm:$0xff]  ;;  %v88_v13 = vld [vmem:[#allocation2 + $0x58] sm:$0xff] }
  0x37   :  { %1777 = vmatmul.mubr.msk.f32.vlgmr.msra.gmra.mxu0 %vm97_vm0, %v78_v3  ;;  %v89_v14 = vld [vmem:[#allocation2 + $0x60] sm:$0xff]  ;;  %v90_v15 = vld [vmem:[#allocation2 + $0x68] sm:$0xff]  ;;  %v91_v16 = vld [vmem:[#allocation2 + $0x70] sm:$0xff]  ;;  %1830 = vmatprep.subr.mxu0 %v2018_v61 }
  0x38   :  { %1779 = vmatprep.mubr.msk.f32.mxu0 %vm97_vm0, %v79_v4  ;;  %v92_v17 = vld [vmem:[#allocation2 + $0x78] sm:$0xff]  ;;  %v96_v18 = vld [vmem:[#allocation5 + $0x8] sm:$0xff]  ;;  %v95_v19 = vld [vmem:[#allocation5] sm:$0xff] }
  0x39   :  { %1800 = vmatprep.subr.mxu1 %v96_v18  ;;  %v941_v44 = vld [vmem:[#allocation8] sm:$0xff] }
  0x3a   :  { %1801 = vmatpush3.msra.mxu1 %v96_v18  ;;  %v942_v62 = vld [vmem:[%s2159_s3] sm:$0xf]  ;;  %s2020_s3 = smov [#allocation10]  }
  0x3b   :  { %1780 = vmatmul.mubr.msk.f32.gmra.mxu0 %vm97_vm0, %v80_v5  ;;  %1802 = vmatprep.subr.mxu1 %v95_v19  ;;  %s1649_s17 = sshll.u32 %s2020_s3, 4  ;;  %s1650_s17 = int_to_ptr.vmem [resolvable:$true] %s1649_s17 }
  0x3c   :  { %1782 = vmatprep.mubr.msk.f32.mxu0 %vm97_vm0, %v81_v6  ;;  %1803 = vmatpush3.msra.mxu1 %v95_v19  ;;  %s1962_s18 = scalar_lea.vmem %s1650_s17, 1024  ;;  %p1967_p7 = scmp.lt.s32.totalorder %s1650_s17, %s1650_s17 }
  0x3d   :  { %1816 = vmatprep.subr.mxu1 %v941_v44  ;;  %p1963_p6 = scmp.ne.s32.totalorder %s1650_s17, %s1962_s18  ;;  %p1968_p8 = scmp.lt.s32.totalorder %s1962_s18, %s1962_s18 }
  0x3f   :  { %1783 = vmatmul.mubr.msk.f32.gmra.mxu0 %vm97_vm0, %v82_v7  ;;  %p1969_p9 = por %p1968_p8, %p1967_p7 }
  0x40   :  { %1785 = vmatprep.mubr.msk.f32.mxu0 %vm97_vm0, %v83_v8 }
  0x41   :  { %p1970_p10 = pnand %p1969_p9, %p1963_p6 }
  0x43   :  { %1786 = vmatmul.mubr.msk.f32.gmra.mxu0 %vm97_vm0, %v84_v9 }
  0x44   :  { %1788 = vmatprep.mubr.msk.f32.mxu0 %vm97_vm0, %v85_v10 }
  0x47   :  { %1789 = vmatmul.mubr.msk.f32.gmra.mxu0 %vm97_vm0, %v86_v11 }
  0x48   :  { %1791 = vmatprep.mubr.msk.f32.mxu0 %vm97_vm0, %v87_v12 }
  0x4b   :  { %1792 = vmatmul.mubr.msk.f32.gmra.mxu0 %vm97_vm0, %v88_v13 }
  0x4c   :  { %1794 = vmatprep.mubr.msk.f32.mxu0 %vm97_vm0, %v89_v14 }
  0x4f   :  { %1795 = vmatmul.mubr.msk.f32.gmra.mxu0 %vm97_vm0, %v90_v15 }
  0x50   :  { %1797 = vmatprep.mubr.msk.f32.mxu0 %vm97_vm0, %v91_v16 }
  0x53   :  { %1798 = vmatmul.mubr.msk.f32.gmra.mxu0 %vm97_vm0, %v92_v17 }
  0x54   :  { %1832 = vmatprep.mubr.msk.f32.mxu0 %vm2019_vm2, %v2018_v61 }
  0xf7   :  { %v1778_v20 = vpop.f32.mrf.mxu0 }
  0xf9   :  { %v212_v21 = vpop.f32.mrf.mxu0 }
  0xfa   :  { %291 = vxpose.xlu0.b32.start [1/2] (short) (narrow) %v212_v21, 8 }
  0xfb   :  { %v1781_v22 = vpop.f32.mrf.mxu0 }
  0xfd   :  { %v222_v23 = vpop.f32.mrf.mxu0 }
  0xfe   :  { %292 = vxpose.xlu0.b32.end [2/2] (short) (narrow) %v1778_v20, 8  ;;  %323 = vxpose.xlu1.b32.start [1/2] (short) (narrow) %v222_v23, 8 }
  0xff   :  { %v1784_v24 = vpop.f32.mrf.mxu0 }
 0x101   :  { %v232_v25 = vpop.f32.mrf.mxu0 }
 0x102   :  { %324 = vxpose.xlu1.b32.end [2/2] (short) (narrow) %v1781_v22, 8  ;;  %355 = vxpose.xlu0.b32.start [1/2] (short) (narrow) %v232_v25, 8 }
 0x103   :  { %v1787_v26 = vpop.f32.mrf.mxu0 }
 0x105   :  { %v242_v27 = vpop.f32.mrf.mxu0 }
 0x106   :  { %356 = vxpose.xlu0.b32.end [2/2] (short) (narrow) %v1784_v24, 8  ;;  %387 = vxpose.xlu1.b32.start [1/2] (short) (narrow) %v242_v27, 8 }
 0x107   :  { %v1790_v28 = vpop.f32.mrf.mxu0 }
 0x109   :  { %v252_v29 = vpop.f32.mrf.mxu0 }
 0x10a   :  { %388 = vxpose.xlu1.b32.end [2/2] (short) (narrow) %v1787_v26, 8  ;;  %419 = vxpose.xlu0.b32.start [1/2] (short) (narrow) %v252_v29, 8 }
 0x10b   :  { %v1793_v30 = vpop.f32.mrf.mxu0 }
 0x10d   :  { %v262_v31 = vpop.f32.mrf.mxu0 }
 0x10e   :  { %420 = vxpose.xlu0.b32.end [2/2] (short) (narrow) %v1790_v28, 8  ;;  %451 = vxpose.xlu1.b32.start [1/2] (short) (narrow) %v262_v31, 8 }
 0x10f   :  { %v1796_v32 = vpop.f32.mrf.mxu0 }
 0x111   :  { %v272_v33 = vpop.f32.mrf.mxu0 }
 0x112   :  { %452 = vxpose.xlu1.b32.end [2/2] (short) (narrow) %v1793_v30, 8  ;;  %483 = vxpose.xlu0.b32.start [1/2] (short) (narrow) %v272_v33, 8 }
 0x113   :  { %v1799_v34 = vpop.f32.mrf.mxu0 }
 0x115   :  { %v282_v35 = vpop.f32.mrf.mxu0 }
 0x116   :  { %484 = vxpose.xlu0.b32.end [2/2] (short) (narrow) %v1796_v32, 8  ;;  %515 = vxpose.xlu1.b32.start [1/2] (short) (narrow) %v282_v35, 8 }
 0x11a   :  { %516 = vxpose.xlu1.b32.end [2/2] (short) (narrow) %v1799_v34, 8 }
 0x176   :  { %v307_v36 = vpop.trf.xlu0 }
 0x177   :  { %1804 = vmatprep.mubr.msk.f32.mxu1 %vm97_vm0, %v307_v36 }
 0x17a   :  { %v339_v37 = vpop.trf.xlu1 }
 0x17b   :  { %1805 = vmatmul.mubr.msk.f32.vlgmr.msra.gmra.mxu1 %vm97_vm0, %v339_v37 }
 0x17c   :  { %1817 = vmatpush3.msra.mxu1 %v941_v44 }
 0x17d   :  { %1835 = vmatprep.subr.mxu1 %v2018_v61 }
 0x17e   :  { %v371_v38 = vpop.trf.xlu0 }
 0x17f   :  { %1807 = vmatprep.mubr.msk.f32.mxu1 %vm97_vm0, %v371_v38 }
 0x182   :  { %v403_v39 = vpop.trf.xlu1 }
 0x183   :  { %1808 = vmatmul.mubr.msk.f32.gmra.mxu1 %vm97_vm0, %v403_v39 }
 0x186   :  { %v435_v40 = vpop.trf.xlu0 }
 0x187   :  { %1810 = vmatprep.mubr.msk.f32.mxu1 %vm97_vm0, %v435_v40 }
 0x18a   :  { %v467_v41 = vpop.trf.xlu1 }
 0x18b   :  { %1811 = vmatmul.mubr.msk.f32.gmra.mxu1 %vm97_vm0, %v467_v41 }
 0x18e   :  { %v499_v42 = vpop.trf.xlu0 }
 0x18f   :  { %1813 = vmatprep.mubr.msk.f32.mxu1 %vm97_vm0, %v499_v42 }
 0x192   :  { %v531_v43 = vpop.trf.xlu1 }
 0x193   :  { %1814 = vmatmul.mubr.msk.f32.gmra.mxu1 %vm97_vm0, %v531_v43 }
 0x23b   :  { %v1806_v45 = vpop.f32.mrf.mxu1 }
 0x23c   :  { %708 = vxpose.xlu1.b32.start.end [1/1] (short) (narrow) %v1806_v45, 8 }
 0x23d   :  { %v637_v46 = vpop.f32.mrf.mxu1 }
 0x23e   :  { %676 = vxpose.xlu0.b32.start.end [1/1] (short) (narrow) %v637_v46, 8 }
 0x243   :  { %v1809_v47 = vpop.f32.mrf.mxu1 }
 0x244   :  { %772 = vxpose.xlu1.b32.start.end [1/1] (short) (narrow) %v1809_v47, 8 }
 0x245   :  { %v647_v48 = vpop.f32.mrf.mxu1 }
 0x246   :  { %740 = vxpose.xlu0.b32.start.end [1/1] (short) (narrow) %v647_v48, 8 }
 0x24b   :  { %v1812_v49 = vpop.f32.mrf.mxu1 }
 0x24c   :  { %836 = vxpose.xlu1.b32.start.end [1/1] (short) (narrow) %v1812_v49, 8 }
 0x24d   :  { %v657_v50 = vpop.f32.mrf.mxu1 }
 0x24e   :  { %804 = vxpose.xlu0.b32.start.end [1/1] (short) (narrow) %v657_v50, 8 }
 0x253   :  { %v1815_v51 = vpop.f32.mrf.mxu1 }
 0x254   :  { %900 = vxpose.xlu1.b32.start.end [1/1] (short) (narrow) %v1815_v51, 8 }
 0x255   :  { %v667_v52 = vpop.f32.mrf.mxu1 }
 0x256   :  { %868 = vxpose.xlu0.b32.start.end [1/1] (short) (narrow) %v667_v52, 8 }
 0x2b8   :  { %v724_v53 = vpop.trf.xlu1 }
 0x2b9   :  { %934 = vst.msk [vmem:[#allocation10 + $0x8] sm:$0xff] %vm932_vm1, %v724_v53 }
 0x2ba   :  { %v692_v54 = vpop.trf.xlu0 }
 0x2bb   :  { %933 = vst.msk [vmem:[#allocation10] sm:$0xff] %vm932_vm1, %v692_v54  ;;  %1818 = vmatprep.mubr.msk.f32.mxu1 %vm932_vm1, %v692_v54 }
 0x2bc   :  { %1819 = vmatmul.mubr.msk.f32.vlgmr.msra.gmra.mxu1 %vm932_vm1, %v724_v53 }
 0x2c0   :  { %v788_v55 = vpop.trf.xlu1 }
 0x2c1   :  { %936 = vst.msk [vmem:[#allocation10 + $0x18] sm:$0xff] %vm932_vm1, %v788_v55 }
 0x2c2   :  { %v756_v56 = vpop.trf.xlu0 }
 0x2c3   :  { %935 = vst.msk [vmem:[#allocation10 + $0x10] sm:$0xff] %vm932_vm1, %v756_v56  ;;  %1821 = vmatprep.mubr.msk.f32.mxu1 %vm932_vm1, %v756_v56 }
 0x2c4   :  { %1822 = vmatmul.mubr.msk.f32.gmra.mxu1 %vm932_vm1, %v788_v55 }
 0x2c8   :  { %v852_v57 = vpop.trf.xlu1 }
 0x2c9   :  { %938 = vst.msk [vmem:[#allocation10 + $0x28] sm:$0xff] %vm932_vm1, %v852_v57 }
 0x2ca   :  { %v820_v58 = vpop.trf.xlu0 }
 0x2cb   :  { %937 = vst.msk [vmem:[#allocation10 + $0x20] sm:$0xff] %vm932_vm1, %v820_v58  ;;  %1824 = vmatprep.mubr.msk.f32.mxu1 %vm932_vm1, %v820_v58 }
 0x2cc   :  { %1825 = vmatmul.mubr.msk.f32.gmra.mxu1 %vm932_vm1, %v852_v57 }
 0x2d0   :  { %v916_v59 = vpop.trf.xlu1 }
 0x2d1   :  { %940 = vst.msk [vmem:[#allocation10 + $0x38] sm:$0xff] %vm932_vm1, %v916_v59 }
 0x2d2   :  { %v884_v60 = vpop.trf.xlu0 }
 0x2d3   :  { %939 = vst.msk [vmem:[#allocation10 + $0x30] sm:$0xff] %vm932_vm1, %v884_v60  ;;  %1827 = vmatprep.mubr.msk.f32.mxu1 %vm932_vm1, %v884_v60 }
 0x2d4   :  { %1828 = vmatmul.mubr.msk.f32.gmra.mxu1 %vm932_vm1, %v916_v59 }
 0x2d5   :  { %1837 = vmatprep.mubr.msk.f32.mxu1 %vm2019_vm2, %v2018_v61 }
 0x37c   :  { %v1820_v63 = vpop.f32.mrf.mxu1 }
 0x37d   :  { %1836 = vmatpush3.msra.mxu1 %v1820_v63 }
 0x37e   :  { %v1033_v0 = vpop.f32.mrf.mxu1  ;;  %1845 = vmatprep.subr.mxu1 %v2018_v61  ;;  %1838 = vmatmul.mubr.msk.f32.vlgmr.msra.gmra.mxu1 %vm932_vm1, %v942_v62 }
 0x37f   :  { %1831 = vmatpush3.msra.mxu0 %v1033_v0  ;;  %1847 = vmatprep.mubr.msk.f32.mxu1 %vm2019_vm2, %v2018_v61 }
 0x380   :  { %1840 = vmatprep.subr.mxu0 %v2018_v61  ;;  %1833 = vmatmul.mubr.msk.f32.vlgmr.msra.gmra.mxu0 %vm932_vm1, %v942_v62 }
 0x381   :  { %1842 = vmatprep.mubr.msk.f32.mxu0 %vm2019_vm2, %v2018_v61 }
 0x384   :  { %v1823_v1 = vpop.f32.mrf.mxu1 }
 0x385   :  { %1846 = vmatpush3.msra.mxu1 %v1823_v1 }
 0x386   :  { %v1043_v2 = vpop.f32.mrf.mxu1  ;;  %1855 = vmatprep.subr.mxu1 %v2018_v61  ;;  %1848 = vmatmul.mubr.msk.f32.vlgmr.msra.gmra.mxu1 %vm932_vm1, %v942_v62 }
 0x387   :  { %1841 = vmatpush3.msra.mxu0 %v1043_v2  ;;  %1857 = vmatprep.mubr.msk.f32.mxu1 %vm2019_vm2, %v2018_v61 }
 0x388   :  { %1850 = vmatprep.subr.mxu0 %v2018_v61  ;;  %1843 = vmatmul.mubr.msk.f32.vlgmr.msra.gmra.mxu0 %vm932_vm1, %v942_v62 }
 0x389   :  { %1852 = vmatprep.mubr.msk.f32.mxu0 %vm2019_vm2, %v2018_v61 }
 0x38c   :  { %v1826_v3 = vpop.f32.mrf.mxu1 }
 0x38d   :  { %1856 = vmatpush3.msra.mxu1 %v1826_v3 }
 0x38e   :  { %v1053_v4 = vpop.f32.mrf.mxu1  ;;  %1865 = vmatprep.subr.mxu1 %v2018_v61  ;;  %1858 = vmatmul.mubr.msk.f32.vlgmr.msra.gmra.mxu1 %vm932_vm1, %v942_v62 }
 0x38f   :  { %1851 = vmatpush3.msra.mxu0 %v1053_v4  ;;  %1867 = vmatprep.mubr.msk.f32.mxu1 %vm2019_vm2, %v2018_v61 }
 0x390   :  { %1860 = vmatprep.subr.mxu0 %v2018_v61  ;;  %1853 = vmatmul.mubr.msk.f32.vlgmr.msra.gmra.mxu0 %vm932_vm1, %v942_v62 }
 0x391   :  { %1862 = vmatprep.mubr.msk.f32.mxu0 %vm2019_vm2, %v2018_v61 }
 0x394   :  { %v1829_v5 = vpop.f32.mrf.mxu1 }
 0x395   :  { %1866 = vmatpush3.msra.mxu1 %v1829_v5 }
 0x396   :  { %v1063_v6 = vpop.f32.mrf.mxu1  ;;  %1868 = vmatmul.mubr.msk.f32.vlgmr.msra.gmra.mxu1 %vm932_vm1, %v942_v62 }
 0x397   :  { %1861 = vmatpush3.msra.mxu0 %v1063_v6 }
 0x398   :  { %1863 = vmatmul.mubr.msk.f32.vlgmr.msra.gmra.mxu0 %vm932_vm1, %v942_v62 }
 0x399   :  { %1973 = shalt.err (!%p1970_p10)
}
 0x39a   :  { %1655 = dma.vmem_to_hbm [thread:$0]  %s1650_s17, 1024, %s2161_s5, [#allocation4], %s2014_s26, %s2014_s26, %s2015_s27   ;;  %vm1635_vm3 = vcmask 27648  }
 0x39b   :  { %s2021_s5 = smov [#allocation11]  }
 0x39c   :  { %s1661_s21 = sshll.u32 %s2021_s5, 4  ;;  %s1662_s21 = int_to_ptr.vmem [resolvable:$true] %s1661_s21 }
 0x39d   :  { %s1982_s22 = scalar_lea.vmem %s1662_s21, 512  ;;  %p1987_p12 = scmp.lt.s32.totalorder %s1662_s21, %s1662_s21 }
 0x39e   :  { %p1983_p11 = scmp.ne.s32.totalorder %s1662_s21, %s1982_s22  ;;  %p1988_p13 = scmp.lt.s32.totalorder %s1982_s22, %s1982_s22 }
 0x3a0   :  { %p1989_p0 = por %p1988_p13, %p1987_p12 }
 0x3a2   :  { %p1990_p1 = pnand %p1989_p0, %p1983_p11 }
 0x43e   :  { %v1211_v7 = vpop.f32.mrf.mxu1 }
 0x43f   :  { %1637 = vst.msk [vmem:[#allocation11 + $0x4] sm:$0xf] %vm1635_vm3, %v1211_v7 }
 0x440   :  { %v1141_v8 = vpop.f32.mrf.mxu0  ;;  %v1839_v9 = vpop.f32.mrf.mxu1 }
 0x441   :  { %1636 = vst.msk [vmem:[#allocation11] sm:$0xf] %vm1635_vm3, %v1141_v8 }
 0x442   :  { %v1834_v10 = vpop.f32.mrf.mxu0 }
 0x446   :  { %v1351_v11 = vpop.f32.mrf.mxu1 }
 0x447   :  { %1639 = vst.msk [vmem:[#allocation11 + $0xc] sm:$0xf] %vm1635_vm3, %v1351_v11 }
 0x448   :  { %v1281_v12 = vpop.f32.mrf.mxu0  ;;  %v1849_v13 = vpop.f32.mrf.mxu1 }
 0x449   :  { %1638 = vst.msk [vmem:[#allocation11 + $0x8] sm:$0xf] %vm1635_vm3, %v1281_v12 }
 0x44a   :  { %v1844_v14 = vpop.f32.mrf.mxu0 }
 0x44e   :  { %v1491_v15 = vpop.f32.mrf.mxu1 }
 0x44f   :  { %1641 = vst.msk [vmem:[#allocation11 + $0x14] sm:$0xf] %vm1635_vm3, %v1491_v15 }
 0x450   :  { %v1421_v16 = vpop.f32.mrf.mxu0  ;;  %v1859_v17 = vpop.f32.mrf.mxu1 }
 0x451   :  { %1640 = vst.msk [vmem:[#allocation11 + $0x10] sm:$0xf] %vm1635_vm3, %v1421_v16 }
 0x452   :  { %v1854_v18 = vpop.f32.mrf.mxu0 }
 0x456   :  { %v1631_v19 = vpop.f32.mrf.mxu1 }
 0x457   :  { %1643 = vst.msk [vmem:[#allocation11 + $0x1c] sm:$0xf] %vm1635_vm3, %v1631_v19 }
 0x458   :  { %v1561_v20 = vpop.f32.mrf.mxu0  ;;  %v1869_v21 = vpop.f32.mrf.mxu1 }
 0x459   :  { %1642 = vst.msk [vmem:[#allocation11 + $0x18] sm:$0xf] %vm1635_vm3, %v1561_v20 }
 0x45a   :  { %v1864_v22 = vpop.f32.mrf.mxu0 }
 0x45b   :  { %1993 = shalt.err (!%p1990_p1)
}
 0x45c   :  { %s2022_s23 = smov 64   ;;  %s2023_s24 = smov 4  }
 0x45d   :  { %1667 = dma.vmem_to_hbm [thread:$0]  %s1662_s21, 512, %s2162_s6, [#allocation12], %s2022_s23, %s2022_s23, %s2023_s24  }
 0x45e   :  { %2008 = dma.done.wait [#allocation4], 1024  }
 0x45f   :  { %2009 = vsyncadd [#allocation4], 4294966272 }
 0x460   :  { %2010 = dma.done.wait [#allocation12], 512  }
 0x461   :  { %2011 = vsyncadd [#allocation12], 4294966784 }
 0x462   :  { %1674 = vsyncpa [#allocation3], 1 }
 0x463   :  { %1675 = vsyncpa [#allocation6], 1 }
 0x464   :  { %1676 = vsyncpa [#allocation9], 1 }
 0x465   :  { %1677 = vsyncpa [#allocation4], 1 }
 0x466   :  { %1678 = vsyncpa [#allocation12], 1 }

// kernel: fn.1
= control target key start
LH: loop header
LB: loop body
LE: loop exit
PB: predicated region body
PF: predicated region fallthrough
CT: control target
= control target key end

     0   :  { %12 = vsyncpa [#allocation3], 0  ;;  %s2174_s0 = inlined_call_operand.hbm [shape: f32[8,16,16], index: 0, kind: input, shape index: {}]   ;;  %s2175_s1 = inlined_call_operand.hbm [shape: f32[8,16], index: 1, kind: input, shape index: {}]   ;;  %s2176_s2 = inlined_call_operand.hbm [shape: f32[16,8], index: 2, kind: input, shape index: {}]   ;;  %s2177_s3 = inlined_call_operand.hbm [shape: f32[4,8], index: 3, kind: input, shape index: {}]   ;;  %s2178_s4 = inlined_call_operand.vmem [shape: f32[8,4], index: 4, kind: input, shape index: {}]   ;;  %s2179_s5 = inlined_call_operand.hbm [shape: f32[8,8,8], index: 5, kind: output, shape index: {0}]   ;;  %s2180_s6 = inlined_call_operand.hbm [shape: f32[8,4,4], index: 6, kind: output, shape index: {1}]  }
   0x1   :  { %13 = vsyncpa [#allocation6], 0 }
   0x2   :  { %14 = vsyncpa [#allocation9], 0 }
   0x3   :  { %15 = vsyncpa [#allocation4], 0 }
   0x4   :  { %16 = vsyncpa [#allocation12], 0  ;;  %s1985_s21 = smov [#allocation5]   ;;  %s1986_s23 = smov [#allocation2]  }
   0x5   :  { %s35_s22 = sshll.u32 %s1985_s21, 4  ;;  %s22_s24 = sshll.u32 %s1986_s23, 4  ;;  %s36_s22 = int_to_ptr.vmem [resolvable:$true] %s35_s22  ;;  %s23_s24 = int_to_ptr.vmem [resolvable:$true] %s22_s24 }
   0x6   :  { %s1863_s25 = scalar_lea.vmem %s36_s22, 128  ;;  %p1868_p1 = scmp.lt.s32.totalorder %s36_s22, %s36_s22 }
   0x7   :  { %p1864_p0 = scmp.ne.s32.totalorder %s36_s22, %s1863_s25  ;;  %p1869_p2 = scmp.lt.s32.totalorder %s1863_s25, %s1863_s25 }
   0x9   :  { %p1870_p3 = por %p1869_p2, %p1868_p1 }
   0xb   :  { %p1871_p4 = pnand %p1870_p3, %p1864_p0 }
   0xd   :  { %1874 = shalt.err (!%p1871_p4)
}
   0xe   :  { %38 = dma.hbm_to_vmem [thread:$0]  %s2175_s1, 128, %s36_s22, [#allocation6]  }
   0xf   :  { %s1883_s28 = scalar_lea.vmem %s23_s24, 2048  ;;  %p1888_p6 = scmp.lt.s32.totalorder %s23_s24, %s23_s24 }
  0x10   :  { %p1884_p5 = scmp.ne.s32.totalorder %s23_s24, %s1883_s28  ;;  %p1889_p7 = scmp.lt.s32.totalorder %s1883_s28, %s1883_s28 }
  0x12   :  { %p1890_p8 = por %p1889_p7, %p1888_p6 }
  0x14   :  { %p1891_p9 = pnand %p1890_p8, %p1884_p5 }
  0x16   :  { %1894 = shalt.err (!%p1891_p9)
}
  0x17   :  { %s1987_s29 = smov 128   ;;  %s1988_s30 = smov 8  }
  0x18   :  { %28 = dma.hbm_to_vmem [thread:$0]  %s2174_s0, 2048, %s23_s24, [#allocation3], %s1987_s29, %s1987_s29, %s1988_s30  }
  0x19   :  { %s1989_s9 = smov [#allocation7]   ;;  %s1990_s11 = smov [#allocation8]  }
  0x1a   :  { %s44_s10 = sshll.u32 %s1989_s9, 4  ;;  %s57_s1 = sshll.u32 %s1990_s11, 4  ;;  %s45_s10 = int_to_ptr.vmem [resolvable:$true] %s44_s10  ;;  %s58_s1 = int_to_ptr.vmem [resolvable:$true] %s57_s1 }
  0x1b   :  { %s1903_s12 = scalar_lea.vmem %s45_s10, 256  ;;  %p1908_p11 = scmp.lt.s32.totalorder %s45_s10, %s45_s10 }
  0x1c   :  { %p1904_p10 = scmp.ne.s32.totalorder %s45_s10, %s1903_s12  ;;  %p1909_p12 = scmp.lt.s32.totalorder %s1903_s12, %s1903_s12 }
  0x1e   :  { %p1910_p13 = por %p1909_p12, %p1908_p11 }
  0x20   :  { %p1911_p0 = pnand %p1910_p13, %p1904_p10 }
  0x22   :  { %1914 = shalt.err (!%p1911_p0)
}
  0x23   :  { %50 = dma.hbm_to_vmem [thread:$0]  %s2176_s2, 256, %s45_s10, [#allocation6], %s1987_s29, %s1987_s29, %s1988_s30  }
  0x24   :  { %s1923_s0 = scalar_lea.vmem %s58_s1, 64  ;;  %p1928_p2 = scmp.lt.s32.totalorder %s58_s1, %s58_s1 }
  0x25   :  { %p1924_p1 = scmp.ne.s32.totalorder %s58_s1, %s1923_s0  ;;  %p1929_p3 = scmp.lt.s32.totalorder %s1923_s0, %s1923_s0 }
  0x27   :  { %p1930_p4 = por %p1929_p3, %p1928_p2 }
  0x29   :  { %p1931_p5 = pnand %p1930_p4, %p1924_p1 }
  0x2b   :  { %1934 = shalt.err (!%p1931_p5)
}
  0x2c   :  { %60 = dma.hbm_to_vmem [thread:$0]  %s2177_s3, 64, %s58_s1, [#allocation9]  }
  0x2d   :  { %1975 = dma.done.wait [#allocation3], 2048  }
  0x2e   :  { %1976 = vsyncadd [#allocation3], 4294965248 }
  0x2f   :  { %1977 = dma.done.wait [#allocation6], 384  }
  0x30   :  { %1978 = vsyncadd [#allocation6], 4294966912 }
  0x31   :  { %1979 = dma.done.wait [#allocation9], 64  }
  0x32   :  { %1980 = vsyncadd [#allocation9], 4294967232  ;;  %vm94_vm0 = vcmask 130048   ;;  %v92_v0 = vld [vmem:[#allocation7 + $0x8] sm:$0xff]  ;;  %v91_v1 = vld [vmem:[#allocation7] sm:$0xff]  ;;  %v1991_v18 = vmov 0.0  }
  0x33   :  { %v75_v2 = vld [vmem:[#allocation2] sm:$0xff]  ;;  %1705 = vmatprep.subr.mxu0 %v92_v0  ;;  %v76_v3 = vld [vmem:[#allocation2 + $0x8] sm:$0xff]  ;;  %v77_v4 = vld [vmem:[#allocation2 + $0x10] sm:$0xff]  ;;  %1733 = vmatprep.subr.mxu1 %v1991_v18  ;;  %vm1992_vm1 = vmmov 0   ;;  %vm851_vm2 = vcmask 64512  }
  0x34   :  { %1709 = vmatprep.mubr.msk.f32.mxu0 %vm94_vm0, %v75_v2  ;;  %1706 = vmatpush3.msra.mxu0 %v92_v0  ;;  %v78_v5 = vld [vmem:[#allocation2 + $0x18] sm:$0xff]  ;;  %v79_v6 = vld [vmem:[#allocation2 + $0x20] sm:$0xff]  ;;  %v80_v7 = vld [vmem:[#allocation2 + $0x28] sm:$0xff] }
  0x35   :  { %1707 = vmatprep.subr.mxu0 %v91_v1  ;;  %v81_v8 = vld [vmem:[#allocation2 + $0x30] sm:$0xff]  ;;  %v82_v9 = vld [vmem:[#allocation2 + $0x38] sm:$0xff]  ;;  %v83_v10 = vld [vmem:[#allocation2 + $0x40] sm:$0xff]  ;;  %1737 = vmatprep.mubr.msk.f32.mxu1 %vm1992_vm1, %v1991_v18 }
  0x36   :  { %1708 = vmatpush3.msra.mxu0 %v91_v1  ;;  %v84_v11 = vld [vmem:[#allocation2 + $0x48] sm:$0xff]  ;;  %v85_v12 = vld [vmem:[#allocation2 + $0x50] sm:$0xff]  ;;  %v86_v13 = vld [vmem:[#allocation2 + $0x58] sm:$0xff] }
  0x37   :  { %1710 = vmatmul.mubr.msk.f32.vlgmr.msra.gmra.mxu0 %vm94_vm0, %v76_v3  ;;  %v87_v14 = vld [vmem:[#allocation2 + $0x60] sm:$0xff]  ;;  %v88_v15 = vld [vmem:[#allocation2 + $0x68] sm:$0xff]  ;;  %v89_v16 = vld [vmem:[#allocation2 + $0x70] sm:$0xff] }
  0x38   :  { %1712 = vmatprep.mubr.msk.f32.mxu0 %vm94_vm0, %v77_v4  ;;  %v90_v17 = vld [vmem:[#allocation2 + $0x78] sm:$0xff]  ;;  %v860_v19 = vld [vmem:[%s2178_s4] sm:$0xff]  ;;  %s1993_s4 = smov [#allocation10]  }
  0x39   :  { %1789 = vmatprep.subr.mxu0 %v860_v19  ;;  %v93_v21 = vld [vmem:[#allocation5] sm:$0xff]  ;;  %v861_v54 = vld [vmem:[#allocation8] sm:$0xf]  ;;  %s1568_s17 = sshll.u32 %s1993_s4, 4  ;;  %s1569_s17 = int_to_ptr.vmem [resolvable:$true] %s1568_s17 }
  0x3a   :  { %1790 = vmatpush3.msra.mxu0 %v860_v19  ;;  %s1935_s18 = scalar_lea.vmem %s1569_s17, 1024  ;;  %p1940_p7 = scmp.lt.s32.totalorder %s1569_s17, %s1569_s17 }
  0x3b   :  { %1713 = vmatmul.mubr.msk.f32.gmra.mxu0 %vm94_vm0, %v78_v5  ;;  %1823 = vmatprep.subr.mxu0 %v1991_v18  ;;  %p1936_p6 = scmp.ne.s32.totalorder %s1569_s17, %s1935_s18  ;;  %p1941_p8 = scmp.lt.s32.totalorder %s1935_s18, %s1935_s18 }
  0x3c   :  { %1715 = vmatprep.mubr.msk.f32.mxu0 %vm94_vm0, %v79_v6 }
  0x3d   :  { %p1942_p9 = por %p1941_p8, %p1940_p7 }
  0x3f   :  { %1716 = vmatmul.mubr.msk.f32.gmra.mxu0 %vm94_vm0, %v80_v7  ;;  %p1943_p10 = pnand %p1942_p9, %p1936_p6 }
  0x40   :  { %1718 = vmatprep.mubr.msk.f32.mxu0 %vm94_vm0, %v81_v8 }
  0x43   :  { %1719 = vmatmul.mubr.msk.f32.gmra.mxu0 %vm94_vm0, %v82_v9 }
  0x44   :  { %1721 = vmatprep.mubr.msk.f32.mxu0 %vm94_vm0, %v83_v10 }
  0x47   :  { %1722 = vmatmul.mubr.msk.f32.gmra.mxu0 %vm94_vm0, %v84_v11 }
  0x48   :  { %1724 = vmatprep.mubr.msk.f32.mxu0 %vm94_vm0, %v85_v12 }
  0x4b   :  { %1725 = vmatmul.mubr.msk.f32.gmra.mxu0 %vm94_vm0, %v86_v13 }
  0x4c   :  { %1727 = vmatprep.mubr.msk.f32.mxu0 %vm94_vm0, %v87_v14 }
  0x4f   :  { %1728 = vmatmul.mubr.msk.f32.gmra.mxu0 %vm94_vm0, %v88_v15 }
  0x50   :  { %1730 = vmatprep.mubr.msk.f32.mxu0 %vm94_vm0, %v89_v16 }
  0x53   :  { %1731 = vmatmul.mubr.msk.f32.gmra.mxu0 %vm94_vm0, %v90_v17 }
  0xf7   :  { %v1711_v20 = vpop.f32.mrf.mxu0 }
  0xf8   :  { %1734 = vmatpush3.msra.mxu1 %v1711_v20 }
  0xf9   :  { %v209_v22 = vpop.f32.mrf.mxu0  ;;  %1735 = vmatprep.subr.mxu1 %v1991_v18 }
  0xfa   :  { %1736 = vmatpush3.msra.mxu1 %v209_v22 }
  0xfb   :  { %v1714_v23 = vpop.f32.mrf.mxu0  ;;  %1738 = vmatmul.mubr.msk.f32.vlgmr.msra.gmra.mxu1 %vm94_vm0, %v93_v21  ;;  %1740 = vmatprep.subr.mxu1 %v1991_v18 }
  0xfc   :  { %1741 = vmatpush3.msra.mxu1 %v1714_v23  ;;  %1744 = vmatprep.mubr.msk.f32.mxu1 %vm1992_vm1, %v1991_v18 }
  0xfd   :  { %v219_v24 = vpop.f32.mrf.mxu0  ;;  %1742 = vmatprep.subr.mxu1 %v1991_v18 }
  0xfe   :  { %1743 = vmatpush3.msra.mxu1 %v219_v24 }
  0xff   :  { %v1717_v25 = vpop.f32.mrf.mxu0  ;;  %1745 = vmatmul.mubr.msk.f32.vlgmr.msra.gmra.mxu1 %vm94_vm0, %v93_v21  ;;  %1747 = vmatprep.subr.mxu1 %v1991_v18 }
 0x100   :  { %1748 = vmatpush3.msra.mxu1 %v1717_v25  ;;  %1751 = vmatprep.mubr.msk.f32.mxu1 %vm1992_vm1, %v1991_v18 }
 0x101   :  { %v229_v26 = vpop.f32.mrf.mxu0  ;;  %1749 = vmatprep.subr.mxu1 %v1991_v18 }
 0x102   :  { %1750 = vmatpush3.msra.mxu1 %v229_v26 }
 0x103   :  { %v1720_v27 = vpop.f32.mrf.mxu0  ;;  %1752 = vmatmul.mubr.msk.f32.vlgmr.msra.gmra.mxu1 %vm94_vm0, %v93_v21  ;;  %1754 = vmatprep.subr.mxu1 %v1991_v18 }
 0x104   :  { %1755 = vmatpush3.msra.mxu1 %v1720_v27  ;;  %1758 = vmatprep.mubr.msk.f32.mxu1 %vm1992_vm1, %v1991_v18 }
 0x105   :  { %v239_v28 = vpop.f32.mrf.mxu0  ;;  %1756 = vmatprep.subr.mxu1 %v1991_v18 }
 0x106   :  { %1757 = vmatpush3.msra.mxu1 %v239_v28 }
 0x107   :  { %v1723_v29 = vpop.f32.mrf.mxu0  ;;  %1759 = vmatmul.mubr.msk.f32.vlgmr.msra.gmra.mxu1 %vm94_vm0, %v93_v21  ;;  %1761 = vmatprep.subr.mxu1 %v1991_v18 }
 0x108   :  { %1762 = vmatpush3.msra.mxu1 %v1723_v29  ;;  %1765 = vmatprep.mubr.msk.f32.mxu1 %vm1992_vm1, %v1991_v18 }
 0x109   :  { %v249_v30 = vpop.f32.mrf.mxu0  ;;  %1763 = vmatprep.subr.mxu1 %v1991_v18 }
 0x10a   :  { %1764 = vmatpush3.msra.mxu1 %v249_v30 }
 0x10b   :  { %v1726_v31 = vpop.f32.mrf.mxu0  ;;  %1766 = vmatmul.mubr.msk.f32.vlgmr.msra.gmra.mxu1 %vm94_vm0, %v93_v21  ;;  %1768 = vmatprep.subr.mxu1 %v1991_v18 }
 0x10c   :  { %1769 = vmatpush3.msra.mxu1 %v1726_v31  ;;  %1772 = vmatprep.mubr.msk.f32.mxu1 %vm1992_vm1, %v1991_v18 }
 0x10d   :  { %v259_v32 = vpop.f32.mrf.mxu0  ;;  %1770 = vmatprep.subr.mxu1 %v1991_v18 }
 0x10e   :  { %1771 = vmatpush3.msra.mxu1 %v259_v32 }
 0x10f   :  { %1773 = vmatmul.mubr.msk.f32.vlgmr.msra.gmra.mxu1 %vm94_vm0, %v93_v21  ;;  %v1729_v33 = vpop.f32.mrf.mxu0  ;;  %1775 = vmatprep.subr.mxu1 %v1991_v18 }
 0x110   :  { %1776 = vmatpush3.msra.mxu1 %v1729_v33  ;;  %1779 = vmatprep.mubr.msk.f32.mxu1 %vm1992_vm1, %v1991_v18 }
 0x111   :  { %v269_v34 = vpop.f32.mrf.mxu0  ;;  %1777 = vmatprep.subr.mxu1 %v1991_v18 }
 0x112   :  { %1778 = vmatpush3.msra.mxu1 %v269_v34 }
 0x113   :  { %v1732_v35 = vpop.f32.mrf.mxu0  ;;  %1780 = vmatmul.mubr.msk.f32.vlgmr.msra.gmra.mxu1 %vm94_vm0, %v93_v21  ;;  %1782 = vmatprep.subr.mxu1 %v1991_v18 }
 0x114   :  { %1783 = vmatpush3.msra.mxu1 %v1732_v35  ;;  %1786 = vmatprep.mubr.msk.f32.mxu1 %vm1992_vm1, %v1991_v18 }
 0x115   :  { %v279_v36 = vpop.f32.mrf.mxu0  ;;  %1784 = vmatprep.subr.mxu1 %v1991_v18 }
 0x116   :  { %1785 = vmatpush3.msra.mxu1 %v279_v36 }
 0x117   :  { %1787 = vmatmul.mubr.msk.f32.vlgmr.msra.gmra.mxu1 %vm94_vm0, %v93_v21  ;;  %1803 = vmatprep.subr.mxu1 %v1991_v18 }
 0x118   :  { %1805 = vmatprep.mubr.msk.f32.mxu1 %vm1992_vm1, %v1991_v18 }
 0x1bb   :  { %v357_v37 = vpop.f32.mrf.mxu1 }
 0x1bc   :  { %852 = vst.msk [vmem:[#allocation10] sm:$0xff] %vm851_vm2, %v357_v37  ;;  %1791 = vmatprep.mubr.msk.f32.mxu0 %vm851_vm2, %v357_v37 }
 0x1bd   :  { %v1739_v38 = vpop.f32.mrf.mxu1 }
 0x1bf   :  { %v427_v39 = vpop.f32.mrf.mxu1 }
 0x1c0   :  { %853 = vst.msk [vmem:[#allocation10 + $0x8] sm:$0xff] %vm851_vm2, %v427_v39  ;;  %1792 = vmatmul.mubr.msk.f32.vlgmr.msra.gmra.mxu0 %vm851_vm2, %v427_v39 }
 0x1c1   :  { %v1746_v40 = vpop.f32.mrf.mxu1 }
 0x1c3   :  { %v497_v41 = vpop.f32.mrf.mxu1 }
 0x1c4   :  { %854 = vst.msk [vmem:[#allocation10 + $0x10] sm:$0xff] %vm851_vm2, %v497_v41  ;;  %1794 = vmatprep.mubr.msk.f32.mxu0 %vm851_vm2, %v497_v41 }
 0x1c5   :  { %v1753_v42 = vpop.f32.mrf.mxu1 }
 0x1c7   :  { %v567_v43 = vpop.f32.mrf.mxu1 }
 0x1c8   :  { %855 = vst.msk [vmem:[#allocation10 + $0x18] sm:$0xff] %vm851_vm2, %v567_v43  ;;  %1795 = vmatmul.mubr.msk.f32.gmra.mxu0 %vm851_vm2, %v567_v43 }
 0x1c9   :  { %v1760_v44 = vpop.f32.mrf.mxu1 }
 0x1cb   :  { %v637_v45 = vpop.f32.mrf.mxu1 }
 0x1cc   :  { %856 = vst.msk [vmem:[#allocation10 + $0x20] sm:$0xff] %vm851_vm2, %v637_v45  ;;  %1797 = vmatprep.mubr.msk.f32.mxu0 %vm851_vm2, %v637_v45 }
 0x1cd   :  { %v1767_v46 = vpop.f32.mrf.mxu1 }
 0x1cf   :  { %v707_v47 = vpop.f32.mrf.mxu1 }
 0x1d0   :  { %857 = vst.msk [vmem:[#allocation10 + $0x28] sm:$0xff] %vm851_vm2, %v707_v47  ;;  %1798 = vmatmul.mubr.msk.f32.gmra.mxu0 %vm851_vm2, %v707_v47 }
 0x1d1   :  { %v1774_v48 = vpop.f32.mrf.mxu1 }
 0x1d3   :  { %v777_v49 = vpop.f32.mrf.mxu1 }
 0x1d4   :  { %858 = vst.msk [vmem:[#allocation10 + $0x30] sm:$0xff] %vm851_vm2, %v777_v49  ;;  %1800 = vmatprep.mubr.msk.f32.mxu0 %vm851_vm2, %v777_v49 }
 0x1d5   :  { %v1781_v50 = vpop.f32.mrf.mxu1 }
 0x1d7   :  { %v847_v51 = vpop.f32.mrf.mxu1 }
 0x1d8   :  { %859 = vst.msk [vmem:[#allocation10 + $0x38] sm:$0xff] %vm851_vm2, %v847_v51  ;;  %1801 = vmatmul.mubr.msk.f32.gmra.mxu0 %vm851_vm2, %v847_v51 }
 0x1d9   :  { %v1788_v52 = vpop.f32.mrf.mxu1  ;;  %1825 = vmatprep.mubr.msk.f32.mxu0 %vm1992_vm1, %v1991_v18 }
 0x280   :  { %v1793_v53 = vpop.f32.mrf.mxu0 }
 0x282   :  { %v952_v55 = vpop.f32.mrf.mxu0 }
 0x283   :  { %1804 = vmatpush3.msra.mxu1 %v952_v55 }
 0x284   :  { %1808 = vmatprep.subr.mxu1 %v1991_v18  ;;  %1806 = vmatmul.mubr.msk.f32.vlgmr.msra.gmra.mxu1 %vm851_vm2, %v861_v54 }
 0x285   :  { %1809 = vmatpush3.msra.mxu1 %v1793_v53  ;;  %1810 = vmatprep.mubr.msk.f32.mxu1 %vm1992_vm1, %v1991_v18 }
 0x286   :  { %1813 = vmatprep.subr.mxu1 %v1991_v18 }
 0x288   :  { %v1796_v56 = vpop.f32.mrf.mxu0  ;;  %1811 = vmatmul.mubr.msk.f32.vlgmr.msra.gmra.mxu1 %vm851_vm2, %v861_v54 }
 0x289   :  { %1815 = vmatprep.mubr.msk.f32.mxu1 %vm1992_vm1, %v1991_v18 }
 0x28a   :  { %v962_v57 = vpop.f32.mrf.mxu0 }
 0x28b   :  { %1814 = vmatpush3.msra.mxu1 %v962_v57 }
 0x28c   :  { %1818 = vmatprep.subr.mxu1 %v1991_v18  ;;  %1816 = vmatmul.mubr.msk.f32.vlgmr.msra.gmra.mxu1 %vm851_vm2, %v861_v54 }
 0x28d   :  { %1819 = vmatpush3.msra.mxu1 %v1796_v56  ;;  %1820 = vmatprep.mubr.msk.f32.mxu1 %vm1992_vm1, %v1991_v18 }
 0x28e   :  { %1828 = vmatprep.subr.mxu1 %v1991_v18 }
 0x290   :  { %v1799_v58 = vpop.f32.mrf.mxu0  ;;  %1821 = vmatmul.mubr.msk.f32.vlgmr.msra.gmra.mxu1 %vm851_vm2, %v861_v54 }
 0x291   :  { %1829 = vmatpush3.msra.mxu1 %v1799_v58  ;;  %1830 = vmatprep.mubr.msk.f32.mxu1 %vm1992_vm1, %v1991_v18 }
 0x292   :  { %v972_v59 = vpop.f32.mrf.mxu0  ;;  %1838 = vmatprep.subr.mxu1 %v1991_v18 }
 0x293   :  { %1824 = vmatpush3.msra.mxu0 %v972_v59 }
 0x294   :  { %1833 = vmatprep.subr.mxu0 %v1991_v18  ;;  %1826 = vmatmul.mubr.msk.f32.vlgmr.msra.gmra.mxu0 %vm851_vm2, %v861_v54 }
 0x295   :  { %1831 = vmatmul.mubr.msk.f32.vlgmr.msra.gmra.mxu1 %vm851_vm2, %v861_v54  ;;  %1835 = vmatprep.mubr.msk.f32.mxu0 %vm1992_vm1, %v1991_v18 }
 0x296   :  { %1840 = vmatprep.mubr.msk.f32.mxu1 %vm1992_vm1, %v1991_v18 }
 0x298   :  { %v1802_v60 = vpop.f32.mrf.mxu0 }
 0x299   :  { %1839 = vmatpush3.msra.mxu1 %v1802_v60 }
 0x29a   :  { %v982_v61 = vpop.f32.mrf.mxu0  ;;  %1841 = vmatmul.mubr.msk.f32.vlgmr.msra.gmra.mxu1 %vm851_vm2, %v861_v54 }
 0x29b   :  { %1834 = vmatpush3.msra.mxu0 %v982_v61 }
 0x29c   :  { %1836 = vmatmul.mubr.msk.f32.vlgmr.msra.gmra.mxu0 %vm851_vm2, %v861_v54 }
 0x29d   :  { %1946 = shalt.err (!%p1943_p10)
}
 0x29e   :  { %1574 = dma.vmem_to_hbm [thread:$0]  %s1569_s17, 1024, %s2179_s5, [#allocation4], %s1987_s29, %s1987_s29, %s1988_s30   ;;  %vm1554_vm3 = vcmask 27648  }
 0x29f   :  { %s1994_s5 = smov [#allocation11]  }
 0x2a0   :  { %s1580_s21 = sshll.u32 %s1994_s5, 4  ;;  %s1581_s21 = int_to_ptr.vmem [resolvable:$true] %s1580_s21 }
 0x2a1   :  { %s1955_s22 = scalar_lea.vmem %s1581_s21, 512  ;;  %p1960_p12 = scmp.lt.s32.totalorder %s1581_s21, %s1581_s21 }
 0x2a2   :  { %p1956_p11 = scmp.ne.s32.totalorder %s1581_s21, %s1955_s22  ;;  %p1961_p13 = scmp.lt.s32.totalorder %s1955_s22, %s1955_s22 }
 0x2a4   :  { %p1962_p0 = por %p1961_p13, %p1960_p12 }
 0x2a6   :  { %p1963_p1 = pnand %p1962_p0, %p1956_p11 }
 0x344   :  { %v1060_v62 = vpop.f32.mrf.mxu1 }
 0x345   :  { %1555 = vst.msk [vmem:[#allocation11] sm:$0xf] %vm1554_vm3, %v1060_v62 }
 0x346   :  { %v1807_v63 = vpop.f32.mrf.mxu1 }
 0x348   :  { %v1130_v0 = vpop.f32.mrf.mxu1 }
 0x349   :  { %1556 = vst.msk [vmem:[#allocation11 + $0x4] sm:$0xf] %vm1554_vm3, %v1130_v0 }
 0x34a   :  { %v1812_v1 = vpop.f32.mrf.mxu1 }
 0x34c   :  { %v1200_v2 = vpop.f32.mrf.mxu1 }
 0x34d   :  { %1557 = vst.msk [vmem:[#allocation11 + $0x8] sm:$0xf] %vm1554_vm3, %v1200_v2 }
 0x34e   :  { %v1817_v3 = vpop.f32.mrf.mxu1 }
 0x350   :  { %v1270_v4 = vpop.f32.mrf.mxu1 }
 0x351   :  { %1558 = vst.msk [vmem:[#allocation11 + $0xc] sm:$0xf] %vm1554_vm3, %v1270_v4 }
 0x352   :  { %v1822_v5 = vpop.f32.mrf.mxu1 }
 0x354   :  { %v1340_v6 = vpop.f32.mrf.mxu0 }
 0x355   :  { %1559 = vst.msk [vmem:[#allocation11 + $0x10] sm:$0xf] %vm1554_vm3, %v1340_v6  ;;  %v1410_v7 = vpop.f32.mrf.mxu1 }
 0x356   :  { %1560 = vst.msk [vmem:[#allocation11 + $0x14] sm:$0xf] %vm1554_vm3, %v1410_v7  ;;  %v1827_v8 = vpop.f32.mrf.mxu0 }
 0x357   :  { %v1832_v9 = vpop.f32.mrf.mxu1 }
 0x35a   :  { %v1550_v10 = vpop.f32.mrf.mxu1 }
 0x35b   :  { %1562 = vst.msk [vmem:[#allocation11 + $0x1c] sm:$0xf] %vm1554_vm3, %v1550_v10 }
 0x35c   :  { %v1480_v11 = vpop.f32.mrf.mxu0  ;;  %v1842_v12 = vpop.f32.mrf.mxu1 }
 0x35d   :  { %1561 = vst.msk [vmem:[#allocation11 + $0x18] sm:$0xf] %vm1554_vm3, %v1480_v11 }
 0x35e   :  { %v1837_v13 = vpop.f32.mrf.mxu0 }
 0x35f   :  { %1966 = shalt.err (!%p1963_p1)
}
 0x360   :  { %s1995_s23 = smov 64   ;;  %s1996_s24 = smov 4  }
 0x361   :  { %1586 = dma.vmem_to_hbm [thread:$0]  %s1581_s21, 512, %s2180_s6, [#allocation12], %s1995_s23, %s1995_s23, %s1996_s24  }
 0x362   :  { %1981 = dma.done.wait [#allocation4], 1024  }
 0x363   :  { %1982 = vsyncadd [#allocation4], 4294966272 }
 0x364   :  { %1983 = dma.done.wait [#allocation12], 512  }
 0x365   :  { %1984 = vsyncadd [#allocation12], 4294966784 }
 0x366   :  { %1593 = vsyncpa [#allocation3], 1 }
 0x367   :  { %1594 = vsyncpa [#allocation6], 1 }
 0x368   :  { %1595 = vsyncpa [#allocation9], 1 }
 0x369   :  { %1596 = vsyncpa [#allocation4], 1 }
 0x36a   :  { %1597 = vsyncpa [#allocation12], 1 }

</bundles_post_ra>
